<compile_context>
chip_gen: v7x
topology: tpu7x:2x2x1
jax: 0.10.0
libtpu: 0.0.40
codegen_flags: <defaults>
</compile_context>

<pallas_src>
import jax
import jax.numpy as jnp
from jax.experimental import pallas as pl
from jax.experimental.pallas import tpu as pltpu

H = W = 16
CIN = 3
COUT = 64
NUM_CLASSES = 102
KH = KW = 3
POOLED = (H // 2) * (W // 2)          # 64 pooled cells (8 x 8)
PATCH = KH * KW * CIN                 # 27
TB_MAX = 64                           # samples per grid step (batch block)


def _round_up(a, b):
    return ((a + b - 1) // b) * b


def cnn_kernel(p_ref, wc_ref, bc_ref, wl_ref, bl_ref, out_ref):
    # p_ref : (TB, 4, POOLED, PATCH) bf16   im2col patches, axis 1 = maxpool sub-pos
    # wc_ref: (PATCH, COUT)          bf16   conv weight flattened (kh,kw,cin) x cout
    # bc_ref: (1, COUT)              f32    conv bias
    # wl_ref: (COUT, CPAD)           f32    linear weight, class dim zero-padded to 128
    # bl_ref: (1, CPAD)              f32    linear bias, zero-padded
    # out_ref: (TB, CPAD)            f32    padded logits
    tb, nsub, pooled, patch = p_ref.shape
    cout = wc_ref.shape[1]

    # One fused MXU matmul for all samples and all 4 maxpool sub-positions.
    x = p_ref[...].reshape(tb * nsub * pooled, patch)                 # (TB*256, 27)
    conv = jnp.dot(x, wc_ref[...], preferred_element_type=jnp.float32)  # (TB*256, 64)
    conv = conv.reshape(tb, nsub, pooled, cout)                        # (TB, 4, 64, 64)

    # Elementwise max over the 4 sub-positions == MaxPool2d(kernel=2, stride=2)
    mx = jnp.maximum(jnp.maximum(conv[:, 0], conv[:, 1]),
                     jnp.maximum(conv[:, 2], conv[:, 3]))              # (TB, 64, 64)

    # Bias + ReLU hoisted outside the max (both monotone increasing).
    act = jnp.maximum(mx + bc_ref[...], 0.0)                           # (TB, 64, 64)

    # AdaptiveAvgPool2d((1,1)) == mean over the pooled spatial cells.
    avg = jnp.sum(act, axis=1) * (1.0 / pooled)                        # (TB, 64)

    # Dropout(0.5) is identity in eval mode.  Batched, lane-dense classifier.
    logits = jnp.dot(avg, wl_ref[...],
                     preferred_element_type=jnp.float32) + bl_ref[...]  # (TB, 128)
    out_ref[...] = logits


@jax.jit
def cnn_forward(x_nchw, w_conv_oihw, b_conv, w_lin, b_lin):
    """x_nchw: (N,3,H,W); conv weight OIHW (64,3,3,3); linear weight (102,64)."""
    N = x_nchw.shape[0]
    num_classes = w_lin.shape[0]
    cpad = _round_up(num_classes, 128)

    # NCHW -> NHWC, pad spatial by 1 (conv padding=1)
    x = jnp.transpose(x_nchw, (0, 2, 3, 1)).astype(jnp.float32)
    xp = jnp.pad(x, ((0, 0), (1, 1), (1, 1), (0, 0)))

    # im2col: patch vector ordered (kh, kw, cin)
    patches = jnp.stack(
        [xp[:, dy:dy + H, dx:dx + W, :] for dy in range(KH) for dx in range(KW)],
        axis=3,
    )                                                        # (N, H, W, 9, CIN)
    patches = patches.reshape(N, H, W, PATCH)
    # regroup rows by (pool_sub_pos, pooled_cell) so maxpool is an elementwise max
    patches = patches.reshape(N, H // 2, 2, W // 2, 2, PATCH)  # (N, bh, py, bw, px, 27)
    patches = patches.transpose(0, 2, 4, 1, 3, 5)              # (N, py, px, bh, bw, 27)
    patches = patches.reshape(N, 4, POOLED, PATCH).astype(jnp.bfloat16)

    # Batch blocking: TB samples per grid step, pad N up to a multiple of TB.
    tb = min(TB_MAX, _round_up(N, 8))
    n_pad = _round_up(N, tb)
    if n_pad != N:
        patches = jnp.pad(patches, ((0, n_pad - N), (0, 0), (0, 0), (0, 0)))

    # Weights: conv OIHW -> HWIO -> (27,64) bf16; classifier padded to 128 outputs.
    wc = jnp.transpose(w_conv_oihw, (2, 3, 1, 0)).reshape(PATCH, COUT).astype(jnp.bfloat16)
    bc = b_conv.reshape(1, COUT).astype(jnp.float32)
    wl = jnp.pad(w_lin.T.astype(jnp.float32), ((0, 0), (0, cpad - num_classes)))
    bl = jnp.pad(b_lin.reshape(1, num_classes).astype(jnp.float32),
                 ((0, 0), (0, cpad - num_classes)))

    out = pl.pallas_call(
        cnn_kernel,
        out_shape=jax.ShapeDtypeStruct((n_pad, cpad), jnp.float32),
        grid_spec=pltpu.PrefetchScalarGridSpec(
            num_scalar_prefetch=0,
            grid=(n_pad // tb,),
            in_specs=[
                pl.BlockSpec((tb, 4, POOLED, PATCH), lambda n: (n, 0, 0, 0)),
                pl.BlockSpec((PATCH, COUT), lambda n: (0, 0)),
                pl.BlockSpec((1, COUT), lambda n: (0, 0)),
                pl.BlockSpec((COUT, cpad), lambda n: (0, 0)),
                pl.BlockSpec((1, cpad), lambda n: (0, 0)),
            ],
            out_specs=pl.BlockSpec((tb, cpad), lambda n: (n, 0)),
        ),
        compiler_params=pltpu.CompilerParams(
            dimension_semantics=("parallel",),
            vmem_limit_bytes=48 * 1024 * 1024,
        ),
    )(patches, wc, bc, wl, bl)

    return out[:N, :num_classes]


if __name__ == "__main__":
    key = jax.random.PRNGKey(0)
    k_x, k_wc, k_bc, k_wl, k_bl = jax.random.split(key, 5)

    # small deterministic example: batch=2, 3x16x16 input (NCHW, like PyTorch)
    x = jax.random.normal(k_x, (2, CIN, H, W), dtype=jnp.float32)

    # PyTorch-layout parameters: conv OIHW, linear (out_features, in_features)
    w_conv = jax.random.normal(k_wc, (COUT, CIN, KH, KW), dtype=jnp.float32) * (1.0 / PATCH) ** 0.5
    b_conv = jax.random.normal(k_bc, (COUT,), dtype=jnp.float32) * 0.05
    w_lin = jax.random.normal(k_wl, (NUM_CLASSES, COUT), dtype=jnp.float32) * (1.0 / COUT) ** 0.5
    b_lin = jax.random.normal(k_bl, (NUM_CLASSES,), dtype=jnp.float32) * 0.05

    out = cnn_forward(x, w_conv, b_conv, w_lin, b_lin)
    jax.block_until_ready(out)
    assert out.shape == (2, NUM_CLASSES)
    print("KERNEL_OK")
</pallas_src>

<mosaic_0001>
module attributes {stable_mosaic.version = 11 : i64} {
  func.func @cnn_kernel(%arg0: i32, %arg1: memref<8x4x64x27xbf16, #tpu.memory_space<vmem>>, %arg2: memref<27x64xbf16, #tpu.memory_space<vmem>>, %arg3: memref<1x64xf32, #tpu.memory_space<vmem>>, %arg4: memref<64x128xf32, #tpu.memory_space<vmem>>, %arg5: memref<1x128xf32, #tpu.memory_space<vmem>>, %arg6: memref<8x128xf32, #tpu.memory_space<vmem>>) attributes {dimension_semantics = [#tpu.dimension_semantics<parallel>], iteration_bounds = array<i64: 1>, scalar_prefetch = 0 : i64, scratch_operands = 0 : i64, tpu.core_type = #tpu.core_type<tc>, window_params = [{transform_indices = @transform_0, window_bounds = array<i64: 8, 4, 64, 27>}, {pipeline_mode = #tpu.pipeline_mode<synchronous>, transform_indices = @transform_1, window_bounds = array<i64: 27, 64>}, {pipeline_mode = #tpu.pipeline_mode<synchronous>, transform_indices = @transform_2, window_bounds = array<i64: 1, 64>}, {pipeline_mode = #tpu.pipeline_mode<synchronous>, transform_indices = @transform_3, window_bounds = array<i64: 64, 128>}, {pipeline_mode = #tpu.pipeline_mode<synchronous>, transform_indices = @transform_4, window_bounds = array<i64: 1, 128>}, {transform_indices = @transform_5, window_bounds = array<i64: 8, 128>}]} {
    %c0 = arith.constant 0 : index
    %c0_0 = arith.constant 0 : index
    %c0_1 = arith.constant 0 : index
    %c0_2 = arith.constant 0 : index
    %0 = vector.load %arg1[%c0, %c0_0, %c0_1, %c0_2] : memref<8x4x64x27xbf16, #tpu.memory_space<vmem>>, vector<8x4x64x27xbf16>
    %1 = vector.shape_cast %0 : vector<8x4x64x27xbf16> to vector<2048x27xbf16>
    %c0_3 = arith.constant 0 : index
    %c0_4 = arith.constant 0 : index
    %2 = vector.load %arg2[%c0_3, %c0_4] : memref<27x64xbf16, #tpu.memory_space<vmem>>, vector<27x64xbf16>
    %cst = arith.constant dense<0.000000e+00> : vector<2048x64xf32>
    %3 = tpu.matmul %1, %2, %cst {dimension_numbers = #tpu.dot_dimension_numbers<[1], [0], [0], [1], [0, 0, 1, 1], [], []>} : vector<2048x27xbf16>, vector<27x64xbf16>, vector<2048x64xf32> -> vector<2048x64xf32>
    %4 = vector.shape_cast %3 : vector<2048x64xf32> to vector<8x4x64x64xf32>
    %5 = vector.extract_strided_slice %4 {offsets = [0, 0, 0, 0], sizes = [8, 1, 64, 64], strides = [1, 1, 1, 1]} : vector<8x4x64x64xf32> to vector<8x1x64x64xf32>
    %6 = vector.shape_cast %5 : vector<8x1x64x64xf32> to vector<8x64x64xf32>
    %7 = vector.extract_strided_slice %4 {offsets = [0, 1, 0, 0], sizes = [8, 1, 64, 64], strides = [1, 1, 1, 1]} : vector<8x4x64x64xf32> to vector<8x1x64x64xf32>
    %8 = vector.shape_cast %7 : vector<8x1x64x64xf32> to vector<8x64x64xf32>
    %9 = arith.maximumf %6, %8 : vector<8x64x64xf32>
    %10 = vector.extract_strided_slice %4 {offsets = [0, 2, 0, 0], sizes = [8, 1, 64, 64], strides = [1, 1, 1, 1]} : vector<8x4x64x64xf32> to vector<8x1x64x64xf32>
    %11 = vector.shape_cast %10 : vector<8x1x64x64xf32> to vector<8x64x64xf32>
    %12 = vector.extract_strided_slice %4 {offsets = [0, 3, 0, 0], sizes = [8, 1, 64, 64], strides = [1, 1, 1, 1]} : vector<8x4x64x64xf32> to vector<8x1x64x64xf32>
    %13 = vector.shape_cast %12 : vector<8x1x64x64xf32> to vector<8x64x64xf32>
    %14 = arith.maximumf %11, %13 : vector<8x64x64xf32>
    %15 = arith.maximumf %9, %14 : vector<8x64x64xf32>
    %c0_5 = arith.constant 0 : index
    %c0_6 = arith.constant 0 : index
    %16 = vector.load %arg3[%c0_5, %c0_6] : memref<1x64xf32, #tpu.memory_space<vmem>>, vector<1x64xf32>
    %17 = vector.shape_cast %16 : vector<1x64xf32> to vector<1x1x64xf32>
    %18 = vector.broadcast %17 : vector<1x1x64xf32> to vector<8x64x64xf32>
    %19 = arith.addf %15, %18 : vector<8x64x64xf32>
    %cst_7 = arith.constant 0.000000e+00 : f32
    %20 = vector.broadcast %cst_7 : f32 to vector<8x64x64xf32>
    %21 = arith.maximumf %19, %20 : vector<8x64x64xf32>
    %cst_8 = arith.constant dense<0.000000e+00> : vector<8x64xf32>
    %22 = vector.multi_reduction <add>, %21, %cst_8 [1] : vector<8x64x64xf32> to vector<8x64xf32>
    %cst_9 = arith.constant 1.562500e-02 : f32
    %23 = vector.broadcast %cst_9 : f32 to vector<8x64xf32>
    %24 = arith.mulf %22, %23 : vector<8x64xf32>
    %c0_10 = arith.constant 0 : index
    %c0_11 = arith.constant 0 : index
    %25 = vector.load %arg4[%c0_10, %c0_11] : memref<64x128xf32, #tpu.memory_space<vmem>>, vector<64x128xf32>
    %cst_12 = arith.constant dense<0.000000e+00> : vector<8x128xf32>
    %26 = tpu.matmul %24, %25, %cst_12 {dimension_numbers = #tpu.dot_dimension_numbers<[1], [0], [0], [1], [0, 0, 1, 1], [], []>} : vector<8x64xf32>, vector<64x128xf32>, vector<8x128xf32> -> vector<8x128xf32>
    %c0_13 = arith.constant 0 : index
    %c0_14 = arith.constant 0 : index
    %27 = vector.load %arg5[%c0_13, %c0_14] : memref<1x128xf32, #tpu.memory_space<vmem>>, vector<1x128xf32>
    %28 = vector.broadcast %27 : vector<1x128xf32> to vector<8x128xf32>
    %29 = arith.addf %26, %28 : vector<8x128xf32>
    %c0_15 = arith.constant 0 : index
    %c0_16 = arith.constant 0 : index
    %30 = vector.load %arg6[%c0_15, %c0_16] : memref<8x128xf32, #tpu.memory_space<vmem>>, vector<8x128xf32>
    tpu.vector_store %arg6[%c0_15, %c0_16], %29 {strides = array<i32>} : memref<8x128xf32, #tpu.memory_space<vmem>>, vector<8x128xf32>,
    return
  }
  func.func @transform_0(%arg0: i32) -> (i32, i32, i32, i32) {
    %c0_i32 = arith.constant 0 : i32
    %c0_i32_0 = arith.constant 0 : i32
    %c0_i32_1 = arith.constant 0 : i32
    %c0_i32_2 = arith.constant 0 : i32
    return %arg0, %c0_i32, %c0_i32_0, %c0_i32_1 : i32, i32, i32, i32
  }
  func.func @transform_1(%arg0: i32) -> (i32, i32) {
    %c0_i32 = arith.constant 0 : i32
    %c0_i32_0 = arith.constant 0 : i32
    %c0_i32_1 = arith.constant 0 : i32
    return %c0_i32, %c0_i32_0 : i32, i32
  }
  func.func @transform_2(%arg0: i32) -> (i32, i32) {
    %c0_i32 = arith.constant 0 : i32
    %c0_i32_0 = arith.constant 0 : i32
    %c0_i32_1 = arith.constant 0 : i32
    return %c0_i32, %c0_i32_0 : i32, i32
  }
  func.func @transform_3(%arg0: i32) -> (i32, i32) {
    %c0_i32 = arith.constant 0 : i32
    %c0_i32_0 = arith.constant 0 : i32
    %c0_i32_1 = arith.constant 0 : i32
    return %c0_i32, %c0_i32_0 : i32, i32
  }
  func.func @transform_4(%arg0: i32) -> (i32, i32) {
    %c0_i32 = arith.constant 0 : i32
    %c0_i32_0 = arith.constant 0 : i32
    %c0_i32_1 = arith.constant 0 : i32
    return %c0_i32, %c0_i32_0 : i32, i32
  }
  func.func @transform_5(%arg0: i32) -> (i32, i32) {
    %c0_i32 = arith.constant 0 : i32
    %c0_i32_0 = arith.constant 0 : i32
    return %arg0, %c0_i32 : i32, i32
  }
}

</mosaic_0001>

<bundles_post_ra>
// kernel: cnn_forward.1
= control target key start
LH: loop header
LB: loop body
LE: loop exit
PB: predicated region body
PF: predicated region fallthrough
CT: control target
= control target key end

     0   :  { %vm1317_vm0 = vcmask 1044480   ;;  %vm1318_vm1 = vcmask 1045504   ;;  %vm932_vm2 = vcmask 220160   ;;  %v3829_v1 = vmov 65535   ;;  %s5205_s1 = inlined_call_operand.vmem [shape: bf16[27,64], index: 1, kind: input, shape index: {}]   ;;  %s5206_s0 = inlined_call_operand.vmem [shape: bf16[8,4,64,27], index: 0, kind: input, shape index: {}]   ;;  %s5207_s3 = inlined_call_operand.vmem [shape: f32[64,128], index: 3, kind: input, shape index: {}]   ;;  %s5208_s2 = inlined_call_operand.vmem [shape: f32[1,64], index: 2, kind: input, shape index: {}]   ;;  %s5209_s4 = inlined_call_operand.vmem [shape: f32[1,128], index: 4, kind: input, shape index: {}]   ;;  %s5210_s5 = inlined_call_operand.vmem [shape: f32[8,128], index: 5, kind: output, shape index: {}]  }
   0x1   :  { %v3698_v0 = vld [vmem:[%s5205_s1] sm:$0xff]   ;;  %v1319_v2 = vsel %vm1317_vm0, 4294967295, %v3829_v1  ;;  %v3699_v3 = vld [vmem:[%s5205_s1 + $0x8] sm:$0x3f]   ;;  %v3701_v7 = vld [vmem:[%s5206_s0 + $0x210] sm:$0xff]   ;;  %vm2708_vm3 = vcmask 523264  }
   0x2   :  { %3399 = vmatprep.subr.bf16.mxu0 %v3698_v0  ;;  %3690 = vmatprep.subr.bf16.mxu1 %v3698_v0  ;;  %v1320_v4 = vsel %vm1318_vm1, %v1319_v2, 0  ;;  %v3700_v5 = vld [vmem:[%s5206_s0] sm:$0xff]   ;;  %v3702_v8 = vld [vmem:[%s5206_s0 + $0x8] sm:$0xff]   ;;  %v3703_v9 = vld [vmem:[%s5206_s0 + $0x218] sm:$0xff]   ;;  %vm2908_vm4 = vcmask 1041409   ;;  %vm3831_vm5 = vmmov 0  }
   0x3   :  { %3400 = vmatpush3.bf16.msra.mxu0 %v3698_v0  ;;  %3692 = vmatpush3.bf16.msra.mxu1 %v3698_v0  ;;  %v1322_v6 = vand.u32 %v3699_v3, %v1320_v4  ;;  %v3704_v10 = vld [vmem:[%s5206_s0 + $0x10] sm:$0xff]   ;;  %v3705_v11 = vld [vmem:[%s5206_s0 + $0x220] sm:$0xff]   ;;  %v3706_v12 = vld [vmem:[%s5206_s0 + $0x18] sm:$0xff]   ;;  %vm2910_vm6 = vcmask 1042434   ;;  %vm2912_vm7 = vcmask 1043459   ;;  %vm2914_vm8 = vcmask 1044484  }
   0x4   :  { %3403 = vmatprep.mubr.msk.bf16.mxu0 %vm932_vm2, %v3700_v5  ;;  %3535 = vmatprep.mubr.msk.bf16.mxu1 %vm932_vm2, %v3701_v7  ;;  %v3707_v13 = vld [vmem:[%s5206_s0 + $0x228] sm:$0xff]   ;;  %v3708_v14 = vld [vmem:[%s5206_s0 + $0x20] sm:$0xff]   ;;  %v3709_v15 = vld [vmem:[%s5206_s0 + $0x230] sm:$0xff]   ;;  %vm2916_vm9 = vcmask 1045509   ;;  %vm2918_vm10 = vcmask 1046534   ;;  %vm2920_vm11 = vcmask 1047559  }
   0x5   :  { %3401 = vmatprep.subr.bf16.mxu0 %v1322_v6  ;;  %3691 = vmatprep.subr.bf16.mxu1 %v1322_v6  ;;  %v3710_v16 = vld [vmem:[%s5206_s0 + $0x28] sm:$0xff]   ;;  %v3711_v17 = vld [vmem:[%s5206_s0 + $0x238] sm:$0xff]   ;;  %v3712_v18 = vld [vmem:[%s5206_s0 + $0x30] sm:$0xff]  }
   0x6   :  { %v3713_v19 = vld [vmem:[%s5206_s0 + $0x240] sm:$0xff]   ;;  %v3714_v20 = vld [vmem:[%s5206_s0 + $0x38] sm:$0xff]   ;;  %v3715_v21 = vld [vmem:[%s5206_s0 + $0x248] sm:$0xff]  }
   0x7   :  { %3402 = vmatpush3.bf16.msra.mxu0 %v1322_v6  ;;  %3693 = vmatpush3.bf16.msra.mxu1 %v1322_v6  ;;  %v3716_v22 = vld [vmem:[%s5206_s0 + $0x40] sm:$0xff]   ;;  %v3717_v23 = vld [vmem:[%s5206_s0 + $0x250] sm:$0xff]   ;;  %v3718_v24 = vld [vmem:[%s5206_s0 + $0x48] sm:$0xff]  }
   0x8   :  { %v3719_v25 = vld [vmem:[%s5206_s0 + $0x258] sm:$0xff]   ;;  %v3720_v26 = vld [vmem:[%s5206_s0 + $0x50] sm:$0xff]   ;;  %v3721_v27 = vld [vmem:[%s5206_s0 + $0x260] sm:$0xff]  }
   0x9   :  { %v3722_v28 = vld [vmem:[%s5206_s0 + $0x58] sm:$0xff]   ;;  %v3723_v29 = vld [vmem:[%s5206_s0 + $0x268] sm:$0xff]   ;;  %v3724_v30 = vld [vmem:[%s5206_s0 + $0x60] sm:$0xff]  }
   0xa   :  { %3404 = vmatmul.mubr.msk.bf16.vlgmr.msra.gmra.mrb[0].mxu0 %vm932_vm2, %v3702_v8  ;;  %3536 = vmatmul.mubr.msk.bf16.vlgmr.msra.gmra.mrb[0].mxu1 %vm932_vm2, %v3703_v9  ;;  %v3725_v31 = vld [vmem:[%s5206_s0 + $0x270] sm:$0xff]   ;;  %v3726_v32 = vld [vmem:[%s5206_s0 + $0x68] sm:$0xff]   ;;  %v3727_v33 = vld [vmem:[%s5206_s0 + $0x278] sm:$0xff]  }
   0xb   :  { %3407 = vmatprep.mubr.msk.bf16.mxu0 %vm932_vm2, %v3704_v10  ;;  %3539 = vmatprep.mubr.msk.bf16.mxu1 %vm932_vm2, %v3705_v11  ;;  %v3728_v34 = vld [vmem:[%s5206_s0 + $0x70] sm:$0xff]   ;;  %v3729_v35 = vld [vmem:[%s5206_s0 + $0x280] sm:$0xff]   ;;  %v3730_v36 = vld [vmem:[%s5206_s0 + $0x78] sm:$0xff]  }
   0xc   :  { %v3731_v37 = vld [vmem:[%s5206_s0 + $0x288] sm:$0xff]   ;;  %v3732_v38 = vld [vmem:[%s5206_s0 + $0x80] sm:$0xff]   ;;  %v3733_v39 = vld [vmem:[%s5206_s0 + $0x290] sm:$0xff]  }
   0xd   :  { %v3734_v40 = vld [vmem:[%s5206_s0 + $0x88] sm:$0xff]   ;;  %v3735_v41 = vld [vmem:[%s5206_s0 + $0x298] sm:$0xff]   ;;  %v3736_v42 = vld [vmem:[%s5206_s0 + $0x90] sm:$0xff]  }
   0xe   :  { %v3737_v43 = vld [vmem:[%s5206_s0 + $0x2a0] sm:$0xff]   ;;  %v3738_v44 = vld [vmem:[%s5206_s0 + $0x98] sm:$0xff]   ;;  %v3739_v45 = vld [vmem:[%s5206_s0 + $0x2a8] sm:$0xff]  }
   0xf   :  { %v3740_v46 = vld [vmem:[%s5206_s0 + $0xa0] sm:$0xff]   ;;  %v3741_v47 = vld [vmem:[%s5206_s0 + $0x2b0] sm:$0xff]   ;;  %v3742_v48 = vld [vmem:[%s5206_s0 + $0xa8] sm:$0xff]  }
  0x10   :  { %v3743_v49 = vld [vmem:[%s5206_s0 + $0x2b8] sm:$0xff]   ;;  %v3744_v50 = vld [vmem:[%s5206_s0 + $0xb0] sm:$0xff]   ;;  %v3745_v51 = vld [vmem:[%s5206_s0 + $0x2c0] sm:$0xff]  }
  0x11   :  { %v3746_v52 = vld [vmem:[%s5206_s0 + $0xb8] sm:$0xff]   ;;  %v3747_v53 = vld [vmem:[%s5206_s0 + $0x2c8] sm:$0xff]   ;;  %v3748_v54 = vld [vmem:[%s5206_s0 + $0xc0] sm:$0xff]  }
  0x12   :  { %3408 = vmatmul.mubr.msk.bf16.gmra.mrb[4].mxu0 %vm932_vm2, %v3706_v12  ;;  %3540 = vmatmul.mubr.msk.bf16.gmra.mrb[4].mxu1 %vm932_vm2, %v3707_v13  ;;  %v3749_v55 = vld [vmem:[%s5206_s0 + $0x2d0] sm:$0xff]   ;;  %v3750_v56 = vld [vmem:[%s5206_s0 + $0xc8] sm:$0xff]   ;;  %v3751_v57 = vld [vmem:[%s5206_s0 + $0x2d8] sm:$0xff]  }
  0x13   :  { %3411 = vmatprep.mubr.msk.bf16.mxu0 %vm932_vm2, %v3708_v14  ;;  %3543 = vmatprep.mubr.msk.bf16.mxu1 %vm932_vm2, %v3709_v15  ;;  %v3752_v58 = vld [vmem:[%s5206_s0 + $0xd0] sm:$0xff]   ;;  %v3753_v59 = vld [vmem:[%s5206_s0 + $0x2e0] sm:$0xff]   ;;  %v3754_v60 = vld [vmem:[%s5206_s0 + $0xd8] sm:$0xff]  }
  0x14   :  { %v3755_v61 = vld [vmem:[%s5206_s0 + $0x2e8] sm:$0xff]   ;;  %v3756_v62 = vld [vmem:[%s5206_s0 + $0xe0] sm:$0xff]   ;;  %v3757_v63 = vld [vmem:[%s5206_s0 + $0x2f0] sm:$0xff]  }
  0x15   :  { %v3758_v0 = vld [vmem:[%s5206_s0 + $0xe8] sm:$0xff]   ;;  %v3759_v1 = vld [vmem:[%s5206_s0 + $0x2f8] sm:$0xff]   ;;  %v3760_v2 = vld [vmem:[%s5206_s0 + $0xf0] sm:$0xff]  }
  0x16   :  { %v3761_v3 = vld [vmem:[%s5206_s0 + $0x300] sm:$0xff]   ;;  %v3762_v4 = vld [vmem:[%s5206_s0 + $0xf8] sm:$0xff]   ;;  %v3763_v5 = vld [vmem:[%s5206_s0 + $0x308] sm:$0xff]  }
  0x17   :  { %v3764_v6 = vld [vmem:[%s5206_s0 + $0x100] sm:$0xff]   ;;  %v3765_v7 = vld [vmem:[%s5206_s0 + $0x310] sm:$0xff]   ;;  %v3766_v8 = vld [vmem:[%s5206_s0 + $0x108] sm:$0xff]  }
  0x18   :  { %v3767_v9 = vld [vmem:[%s5206_s0 + $0x318] sm:$0xff]   ;;  %v3768_v10 = vld [vmem:[%s5206_s0 + $0x110] sm:$0xff]   ;;  %v3769_v11 = vld [vmem:[%s5206_s0 + $0x320] sm:$0xff]  }
  0x19   :  { %v3770_v12 = vld [vmem:[%s5206_s0 + $0x118] sm:$0xff]   ;;  %v3771_v13 = vld [vmem:[%s5206_s0 + $0x328] sm:$0xff]   ;;  %v3772_v14 = vld [vmem:[%s5206_s0 + $0x120] sm:$0xff]  }
  0x1a   :  { %3412 = vmatmul.mubr.msk.bf16.gmra.mrb[8].mxu0 %vm932_vm2, %v3710_v16  ;;  %3544 = vmatmul.mubr.msk.bf16.gmra.mrb[8].mxu1 %vm932_vm2, %v3711_v17  ;;  %v3773_v15 = vld [vmem:[%s5206_s0 + $0x330] sm:$0xff]   ;;  %v3774_v16 = vld [vmem:[%s5206_s0 + $0x128] sm:$0xff]   ;;  %v3775_v17 = vld [vmem:[%s5206_s0 + $0x338] sm:$0xff]  }
  0x1b   :  { %3415 = vmatprep.mubr.msk.bf16.mxu0 %vm932_vm2, %v3712_v18  ;;  %3547 = vmatprep.mubr.msk.bf16.mxu1 %vm932_vm2, %v3713_v19  ;;  %v3776_v18 = vld [vmem:[%s5206_s0 + $0x130] sm:$0xff]   ;;  %v3777_v19 = vld [vmem:[%s5206_s0 + $0x340] sm:$0xff]  }
  0x22   :  { %3416 = vmatmul.mubr.msk.bf16.gmra.mrb[12].mxu0 %vm932_vm2, %v3714_v20  ;;  %3548 = vmatmul.mubr.msk.bf16.gmra.mrb[12].mxu1 %vm932_vm2, %v3715_v21  ;;  %v5211_v20 = vmov 0.0|0.0   ;;  %v2885_v21 = vld [vmem:[%s5207_s3] sm:$0xff] }
  0x23   :  { %3419 = vmatprep.mubr.msk.bf16.mxu0 %vm932_vm2, %v3716_v22  ;;  %3551 = vmatprep.mubr.msk.bf16.mxu1 %vm932_vm2, %v3717_v23  ;;  %v2886_v22 = vld [vmem:[%s5207_s3 + $0x8] sm:$0xff]  ;;  %v3778_v23 = vld [vmem:[%s5206_s0 + $0x138] sm:$0xff]  }
  0x24   :  { %3678 = vmatprep.subr.bf16.mxu1 %v5211_v20 }
  0x2a   :  { %3420 = vmatmul.mubr.msk.bf16.gmra.mrb[16].mxu0 %vm932_vm2, %v3718_v24  ;;  %3552 = vmatmul.mubr.msk.bf16.gmra.mrb[16].mxu1 %vm932_vm2, %v3719_v25  ;;  %v3779_v24 = vld [vmem:[%s5206_s0 + $0x348] sm:$0xff]   ;;  %v3679_v25 = vpack.c.bf16 %v2886_v22, %v2885_v21  ;;  %v3818_v21 = vld [vmem:[%s5206_s0 + $0x1d8] sm:$0xff]  }
  0x2b   :  { %3423 = vmatprep.mubr.msk.bf16.mxu0 %vm932_vm2, %v3720_v26  ;;  %3555 = vmatprep.mubr.msk.bf16.mxu1 %vm932_vm2, %v3721_v27  ;;  %v3780_v26 = vld [vmem:[%s5206_s0 + $0x140] sm:$0xff]   ;;  %v3781_v27 = vld [vmem:[%s5206_s0 + $0x350] sm:$0xff]   ;;  %v3819_v22 = vld [vmem:[%s5206_s0 + $0x3e8] sm:$0xff]  }
  0x2c   :  { %3680 = vmatpush3.bf16.msra.mxu1 %v3679_v25  ;;  %v3820_v25 = vld [vmem:[%s5206_s0 + $0x1e0] sm:$0xff]  }
  0x2d   :  { %3681 = vmatprep.subr.bf16.mxu1 %v5211_v20 }
  0x32   :  { %3424 = vmatmul.mubr.msk.bf16.gmra.mrb[20].mxu0 %vm932_vm2, %v3722_v28  ;;  %3556 = vmatmul.mubr.msk.bf16.gmra.mrb[20].mxu1 %vm932_vm2, %v3723_v29  ;;  %v3782_v28 = vld [vmem:[%s5206_s0 + $0x148] sm:$0xff]   ;;  %v3783_v29 = vld [vmem:[%s5206_s0 + $0x358] sm:$0xff]  }
  0x33   :  { %3427 = vmatprep.mubr.msk.bf16.mxu0 %vm932_vm2, %v3724_v30  ;;  %3559 = vmatprep.mubr.msk.bf16.mxu1 %vm932_vm2, %v3725_v31  ;;  %v3784_v30 = vld [vmem:[%s5206_s0 + $0x150] sm:$0xff]   ;;  %v3785_v31 = vld [vmem:[%s5206_s0 + $0x360] sm:$0xff]  }
  0x3a   :  { %3428 = vmatmul.mubr.msk.bf16.gmra.mrb[24].mxu0 %vm932_vm2, %v3726_v32  ;;  %3560 = vmatmul.mubr.msk.bf16.gmra.mrb[24].mxu1 %vm932_vm2, %v3727_v33  ;;  %v3786_v32 = vld [vmem:[%s5206_s0 + $0x158] sm:$0xff]   ;;  %v3787_v33 = vld [vmem:[%s5206_s0 + $0x368] sm:$0xff]  }
  0x3b   :  { %3431 = vmatprep.mubr.msk.bf16.mxu0 %vm932_vm2, %v3728_v34  ;;  %3563 = vmatprep.mubr.msk.bf16.mxu1 %vm932_vm2, %v3729_v35  ;;  %v3788_v34 = vld [vmem:[%s5206_s0 + $0x160] sm:$0xff]   ;;  %v3789_v35 = vld [vmem:[%s5206_s0 + $0x370] sm:$0xff]  }
  0x42   :  { %3432 = vmatmul.mubr.msk.bf16.gmra.mrb[28].mxu0 %vm932_vm2, %v3730_v36  ;;  %3564 = vmatmul.mubr.msk.bf16.gmra.mrb[28].mxu1 %vm932_vm2, %v3731_v37  ;;  %v3790_v36 = vld [vmem:[%s5206_s0 + $0x168] sm:$0xff]   ;;  %v3791_v37 = vld [vmem:[%s5206_s0 + $0x378] sm:$0xff]  }
  0x43   :  { %3435 = vmatprep.mubr.msk.bf16.mxu0 %vm932_vm2, %v3732_v38  ;;  %3567 = vmatprep.mubr.msk.bf16.mxu1 %vm932_vm2, %v3733_v39  ;;  %v3792_v38 = vld [vmem:[%s5206_s0 + $0x170] sm:$0xff]   ;;  %v3793_v39 = vld [vmem:[%s5206_s0 + $0x380] sm:$0xff]  }
  0x4a   :  { %3436 = vmatmul.mubr.msk.bf16.gmra.mrb[32].mxu0 %vm932_vm2, %v3734_v40  ;;  %3568 = vmatmul.mubr.msk.bf16.gmra.mrb[32].mxu1 %vm932_vm2, %v3735_v41  ;;  %v3794_v40 = vld [vmem:[%s5206_s0 + $0x178] sm:$0xff]   ;;  %v3795_v41 = vld [vmem:[%s5206_s0 + $0x388] sm:$0xff]  }
  0x4b   :  { %3439 = vmatprep.mubr.msk.bf16.mxu0 %vm932_vm2, %v3736_v42  ;;  %3571 = vmatprep.mubr.msk.bf16.mxu1 %vm932_vm2, %v3737_v43  ;;  %v3796_v42 = vld [vmem:[%s5206_s0 + $0x180] sm:$0xff]   ;;  %v3797_v43 = vld [vmem:[%s5206_s0 + $0x390] sm:$0xff]  }
  0x52   :  { %3440 = vmatmul.mubr.msk.bf16.gmra.mrb[36].mxu0 %vm932_vm2, %v3738_v44  ;;  %3572 = vmatmul.mubr.msk.bf16.gmra.mrb[36].mxu1 %vm932_vm2, %v3739_v45  ;;  %v3798_v44 = vld [vmem:[%s5206_s0 + $0x188] sm:$0xff]   ;;  %v3799_v45 = vld [vmem:[%s5206_s0 + $0x398] sm:$0xff]  }
  0x53   :  { %3443 = vmatprep.mubr.msk.bf16.mxu0 %vm932_vm2, %v3740_v46  ;;  %3575 = vmatprep.mubr.msk.bf16.mxu1 %vm932_vm2, %v3741_v47  ;;  %v3800_v46 = vld [vmem:[%s5206_s0 + $0x190] sm:$0xff]   ;;  %v3801_v47 = vld [vmem:[%s5206_s0 + $0x3a0] sm:$0xff]  }
  0x5a   :  { %3444 = vmatmul.mubr.msk.bf16.gmra.mrb[40].mxu0 %vm932_vm2, %v3742_v48  ;;  %3576 = vmatmul.mubr.msk.bf16.gmra.mrb[40].mxu1 %vm932_vm2, %v3743_v49  ;;  %v3802_v48 = vld [vmem:[%s5206_s0 + $0x198] sm:$0xff]   ;;  %v3803_v49 = vld [vmem:[%s5206_s0 + $0x3a8] sm:$0xff]  }
  0x5b   :  { %3447 = vmatprep.mubr.msk.bf16.mxu0 %vm932_vm2, %v3744_v50  ;;  %3579 = vmatprep.mubr.msk.bf16.mxu1 %vm932_vm2, %v3745_v51  ;;  %v3804_v50 = vld [vmem:[%s5206_s0 + $0x1a0] sm:$0xff]   ;;  %v3805_v51 = vld [vmem:[%s5206_s0 + $0x3b0] sm:$0xff]  }
  0x62   :  { %3448 = vmatmul.mubr.msk.bf16.gmra.mrb[44].mxu0 %vm932_vm2, %v3746_v52  ;;  %3580 = vmatmul.mubr.msk.bf16.gmra.mrb[44].mxu1 %vm932_vm2, %v3747_v53  ;;  %v3806_v52 = vld [vmem:[%s5206_s0 + $0x1a8] sm:$0xff]   ;;  %v3807_v53 = vld [vmem:[%s5206_s0 + $0x3b8] sm:$0xff]  }
  0x63   :  { %3451 = vmatprep.mubr.msk.bf16.mxu0 %vm932_vm2, %v3748_v54  ;;  %3583 = vmatprep.mubr.msk.bf16.mxu1 %vm932_vm2, %v3749_v55  ;;  %v3808_v54 = vld [vmem:[%s5206_s0 + $0x1b0] sm:$0xff]   ;;  %v3809_v55 = vld [vmem:[%s5206_s0 + $0x3c0] sm:$0xff]  }
  0x6a   :  { %3452 = vmatmul.mubr.msk.bf16.gmra.mrb[48].mxu0 %vm932_vm2, %v3750_v56  ;;  %3584 = vmatmul.mubr.msk.bf16.gmra.mrb[48].mxu1 %vm932_vm2, %v3751_v57 }
  0x6b   :  { %3455 = vmatprep.mubr.msk.bf16.mxu0 %vm932_vm2, %v3752_v58  ;;  %3587 = vmatprep.mubr.msk.bf16.mxu1 %vm932_vm2, %v3753_v59  ;;  %v3810_v59 = vld [vmem:[%s5206_s0 + $0x1b8] sm:$0xff]  }
  0x72   :  { %3456 = vmatmul.mubr.msk.bf16.gmra.mrb[52].mxu0 %vm932_vm2, %v3754_v60  ;;  %3588 = vmatmul.mubr.msk.bf16.gmra.mrb[52].mxu1 %vm932_vm2, %v3755_v61  ;;  %v3811_v60 = vld [vmem:[%s5206_s0 + $0x3c8] sm:$0xff]  }
  0x73   :  { %3459 = vmatprep.mubr.msk.bf16.mxu0 %vm932_vm2, %v3756_v62  ;;  %3591 = vmatprep.mubr.msk.bf16.mxu1 %vm932_vm2, %v3757_v63  ;;  %v3812_v63 = vld [vmem:[%s5206_s0 + $0x1c0] sm:$0xff]  }
  0x7a   :  { %3460 = vmatmul.mubr.msk.bf16.gmra.mrb[56].mxu0 %vm932_vm2, %v3758_v0  ;;  %3592 = vmatmul.mubr.msk.bf16.gmra.mrb[56].mxu1 %vm932_vm2, %v3759_v1  ;;  %v3813_v0 = vld [vmem:[%s5206_s0 + $0x3d0] sm:$0xff]  }
  0x7b   :  { %3463 = vmatprep.mubr.msk.bf16.mxu0 %vm932_vm2, %v3760_v2  ;;  %3595 = vmatprep.mubr.msk.bf16.mxu1 %vm932_vm2, %v3761_v3 }
  0x82   :  { %3464 = vmatmul.mubr.msk.bf16.gmra.mrb[60].mxu0 %vm932_vm2, %v3762_v4  ;;  %3596 = vmatmul.mubr.msk.bf16.gmra.mrb[60].mxu1 %vm932_vm2, %v3763_v5 }
  0x83   :  { %3467 = vmatprep.mubr.msk.bf16.mxu0 %vm932_vm2, %v3764_v6  ;;  %3599 = vmatprep.mubr.msk.bf16.mxu1 %vm932_vm2, %v3765_v7  ;;  %v3814_v7 = vld [vmem:[%s5206_s0 + $0x1c8] sm:$0xff]  }
  0x8a   :  { %3468 = vmatmul.mubr.msk.bf16.gmra.mrb[64].mxu0 %vm932_vm2, %v3766_v8  ;;  %3600 = vmatmul.mubr.msk.bf16.gmra.mrb[64].mxu1 %vm932_vm2, %v3767_v9  ;;  %v3815_v8 = vld [vmem:[%s5206_s0 + $0x3d8] sm:$0xff]  }
  0x8b   :  { %3471 = vmatprep.mubr.msk.bf16.mxu0 %vm932_vm2, %v3768_v10  ;;  %3603 = vmatprep.mubr.msk.bf16.mxu1 %vm932_vm2, %v3769_v11  ;;  %v3816_v11 = vld [vmem:[%s5206_s0 + $0x1d0] sm:$0xff]  }
  0x92   :  { %3472 = vmatmul.mubr.msk.bf16.gmra.mrb[68].mxu0 %vm932_vm2, %v3770_v12  ;;  %3604 = vmatmul.mubr.msk.bf16.gmra.mrb[68].mxu1 %vm932_vm2, %v3771_v13  ;;  %v3817_v12 = vld [vmem:[%s5206_s0 + $0x3e0] sm:$0xff]  }
  0x93   :  { %3475 = vmatprep.mubr.msk.bf16.mxu0 %vm932_vm2, %v3772_v14  ;;  %3607 = vmatprep.mubr.msk.bf16.mxu1 %vm932_vm2, %v3773_v15 }
  0x9a   :  { %3476 = vmatmul.mubr.msk.bf16.gmra.mrb[72].mxu0 %vm932_vm2, %v3774_v16  ;;  %3608 = vmatmul.mubr.msk.bf16.gmra.mrb[72].mxu1 %vm932_vm2, %v3775_v17 }
  0x9b   :  { %3479 = vmatprep.mubr.msk.bf16.mxu0 %vm932_vm2, %v3776_v18  ;;  %3611 = vmatprep.mubr.msk.bf16.mxu1 %vm932_vm2, %v3777_v19 }
  0xa2   :  { %3480 = vmatmul.mubr.msk.bf16.gmra.mrb[76].mxu0 %vm932_vm2, %v3778_v23  ;;  %3612 = vmatmul.mubr.msk.bf16.gmra.mrb[76].mxu1 %vm932_vm2, %v3779_v24 }
  0xa3   :  { %3483 = vmatprep.mubr.msk.bf16.mxu0 %vm932_vm2, %v3780_v26  ;;  %3615 = vmatprep.mubr.msk.bf16.mxu1 %vm932_vm2, %v3781_v27 }
  0xaa   :  { %3484 = vmatmul.mubr.msk.bf16.gmra.mrb[80].mxu0 %vm932_vm2, %v3782_v28  ;;  %3616 = vmatmul.mubr.msk.bf16.gmra.mrb[80].mxu1 %vm932_vm2, %v3783_v29 }
  0xab   :  { %3487 = vmatprep.mubr.msk.bf16.mxu0 %vm932_vm2, %v3784_v30  ;;  %3619 = vmatprep.mubr.msk.bf16.mxu1 %vm932_vm2, %v3785_v31  ;;  %v3821_v30 = vld [vmem:[%s5206_s0 + $0x3f0] sm:$0xff]  }
  0xac   :  { %v2887_v31 = vld [vmem:[%s5207_s3 + $0x10] sm:$0xff] }
  0xb2   :  { %3488 = vmatmul.mubr.msk.bf16.gmra.mrb[84].mxu0 %vm932_vm2, %v3786_v32  ;;  %3620 = vmatmul.mubr.msk.bf16.gmra.mrb[84].mxu1 %vm932_vm2, %v3787_v33  ;;  %v2888_v32 = vld [vmem:[%s5207_s3 + $0x18] sm:$0xff] }
  0xb3   :  { %3491 = vmatprep.mubr.msk.bf16.mxu0 %vm932_vm2, %v3788_v34  ;;  %3623 = vmatprep.mubr.msk.bf16.mxu1 %vm932_vm2, %v3789_v35 }
  0xba   :  { %3492 = vmatmul.mubr.msk.bf16.gmra.mrb[88].mxu0 %vm932_vm2, %v3790_v36  ;;  %3624 = vmatmul.mubr.msk.bf16.gmra.mrb[88].mxu1 %vm932_vm2, %v3791_v37  ;;  %v3682_v37 = vpack.c.bf16 %v2888_v32, %v2887_v31  ;;  %v3827_v32 = vld [vmem:[%s5206_s0 + $0x208] sm:$0xff]   ;;  %v4514_v31 = vld [vmem:[%s5208_s2] ss:$0 sm:$0xff] }
  0xbb   :  { %3495 = vmatprep.mubr.msk.bf16.mxu0 %vm932_vm2, %v3792_v38  ;;  %3627 = vmatprep.mubr.msk.bf16.mxu1 %vm932_vm2, %v3793_v39 }
  0xbc   :  { %3683 = vmatpush3.bf16.msra.mxu1 %v3682_v37 }
  0xbd   :  { %3684 = vmatprep.subr.bf16.mxu1 %v5211_v20 }
  0xc2   :  { %3496 = vmatmul.mubr.msk.bf16.gmra.mrb[92].mxu0 %vm932_vm2, %v3794_v40  ;;  %3628 = vmatmul.mubr.msk.bf16.gmra.mrb[92].mxu1 %vm932_vm2, %v3795_v41 }
  0xc3   :  { %3499 = vmatprep.mubr.msk.bf16.mxu0 %vm932_vm2, %v3796_v42  ;;  %3631 = vmatprep.mubr.msk.bf16.mxu1 %vm932_vm2, %v3797_v43 }
  0xca   :  { %3500 = vmatmul.mubr.msk.bf16.gmra.mrb[96].mxu0 %vm932_vm2, %v3798_v44  ;;  %3632 = vmatmul.mubr.msk.bf16.gmra.mrb[96].mxu1 %vm932_vm2, %v3799_v45  ;;  %v3822_v44 = vld [vmem:[%s5206_s0 + $0x1e8] sm:$0xff]   ;;  %v3823_v45 = vld [vmem:[%s5206_s0 + $0x3f8] sm:$0xff]  }
  0xcb   :  { %3503 = vmatprep.mubr.msk.bf16.mxu0 %vm932_vm2, %v3800_v46  ;;  %3635 = vmatprep.mubr.msk.bf16.mxu1 %vm932_vm2, %v3801_v47 }
  0xd2   :  { %3504 = vmatmul.mubr.msk.bf16.gmra.mrb[100].mxu0 %vm932_vm2, %v3802_v48  ;;  %3636 = vmatmul.mubr.msk.bf16.gmra.mrb[100].mxu1 %vm932_vm2, %v3803_v49  ;;  %v3824_v49 = vld [vmem:[%s5206_s0 + $0x1f0] sm:$0xff]  }
  0xd3   :  { %3507 = vmatprep.mubr.msk.bf16.mxu0 %vm932_vm2, %v3804_v50  ;;  %3639 = vmatprep.mubr.msk.bf16.mxu1 %vm932_vm2, %v3805_v51 }
  0xda   :  { %3508 = vmatmul.mubr.msk.bf16.gmra.mrb[104].mxu0 %vm932_vm2, %v3806_v52  ;;  %3640 = vmatmul.mubr.msk.bf16.gmra.mrb[104].mxu1 %vm932_vm2, %v3807_v53 }
  0xdb   :  { %3511 = vmatprep.mubr.msk.bf16.mxu0 %vm932_vm2, %v3808_v54  ;;  %3643 = vmatprep.mubr.msk.bf16.mxu1 %vm932_vm2, %v3809_v55 }
  0xdd   :  { %v4317_v56 = vpop.f32.mrb[0].mxu0  ;;  %v4319_v57 = vpop.f32.mrb[0].mxu1 }
  0xde   :  { %v4321_v58 = vpop.f32.mrb[1].mxu0  ;;  %v4329_v61 = vpop.f32.mrb[1].mxu1 }
  0xdf   :  { %v4331_v62 = vpop.f32.mrb[2].mxu0  ;;  %v4339_v1 = vpop.f32.mrb[2].mxu1 }
  0xe0   :  { %v4341_v2 = vpop.f32.mrb[3].mxu0  ;;  %v4343_v3 = vpop.f32.mrb[3].mxu1 }
  0xe2   :  { %3512 = vmatmul.mubr.msk.bf16.gmra.mrb[108].mxu0 %vm932_vm2, %v3810_v59  ;;  %3644 = vmatmul.mubr.msk.bf16.gmra.mrb[108].mxu1 %vm932_vm2, %v3811_v60 }
  0xe3   :  { %3515 = vmatprep.mubr.msk.bf16.mxu0 %vm932_vm2, %v3812_v63  ;;  %3647 = vmatprep.mubr.msk.bf16.mxu1 %vm932_vm2, %v3813_v0  ;;  %v3825_v63 = vld [vmem:[%s5206_s0 + $0x1f8] sm:$0xff]  }
  0xe5   :  { %v4349_v4 = vpop.f32.mrb[4].mxu0  ;;  %v4351_v5 = vpop.f32.mrb[4].mxu1 }
  0xe6   :  { %v4353_v6 = vpop.f32.mrb[5].mxu0  ;;  %v4361_v9 = vpop.f32.mrb[5].mxu1 }
  0xe7   :  { %v4363_v10 = vpop.f32.mrb[6].mxu0  ;;  %v4371_v13 = vpop.f32.mrb[6].mxu1 }
  0xe8   :  { %5221 = vst [vmem:[#allocation2_spill] sm:$0xff] %v4371_v13  ;;  %v4373_v14 = vpop.f32.mrb[7].mxu0  ;;  %v4375_v15 = vpop.f32.mrb[7].mxu1 }
  0xe9   :  { %5222 = vst [vmem:[#allocation3_spill] sm:$0xff] %v4375_v15 }
  0xea   :  { %3516 = vmatmul.mubr.msk.bf16.gmra.mrb[112].mxu0 %vm932_vm2, %v3814_v7  ;;  %3648 = vmatmul.mubr.msk.bf16.gmra.mrb[112].mxu1 %vm932_vm2, %v3815_v8 }
  0xeb   :  { %3519 = vmatprep.mubr.msk.bf16.mxu0 %vm932_vm2, %v3816_v11  ;;  %3651 = vmatprep.mubr.msk.bf16.mxu1 %vm932_vm2, %v3817_v12  ;;  %v3826_v11 = vld [vmem:[%s5206_s0 + $0x200] sm:$0xff]  }
  0xed   :  { %v4381_v16 = vpop.f32.mrb[8].mxu0  ;;  %v4383_v17 = vpop.f32.mrb[8].mxu1 }
  0xee   :  { %v2383_v18 = vmax.f32 %v4317_v56, %v4381_v16  ;;  %v4387_v19 = vpop.f32.mrb[9].mxu0  ;;  %v2419_v23 = vmax.f32 %v4319_v57, %v4383_v17  ;;  %v4397_v24 = vpop.f32.mrb[9].mxu1 }
  0xef   :  { %v2381_v26 = vmax.f32 %v4321_v58, %v4387_v19  ;;  %v4404_v27 = vpop.f32.mrb[10].mxu0  ;;  %v4408_v29 = vpop.f32.mrb[10].mxu1  ;;  %v5232_v56 = vmax.f32 %v4329_v61, %v4397_v24 }
  0xf0   :  { %v4421_v34 = vpop.f32.mrb[11].mxu0  ;;  %v4425_v36 = vpop.f32.mrb[11].mxu1  ;;  %v5234_v57 = vmax.f32 %v4331_v62, %v4404_v27 }
  0xf1   :  { %v5237_v61 = vmax.f32 %v4341_v2, %v4421_v34  ;;  %v5238_v24 = vmax.f32 %v4343_v3, %v4425_v36 }
  0xf2   :  { %3520 = vmatmul.mubr.msk.bf16.gmra.mrb[116].mxu0 %vm932_vm2, %v3818_v21  ;;  %3652 = vmatmul.mubr.msk.bf16.gmra.mrb[116].mxu1 %vm932_vm2, %v3819_v22 }
  0xf3   :  { %3523 = vmatprep.mubr.msk.bf16.mxu0 %vm932_vm2, %v3820_v25  ;;  %3655 = vmatprep.mubr.msk.bf16.mxu1 %vm932_vm2, %v3821_v30 }
  0xf5   :  { %v4435_v40 = vpop.f32.mrb[12].mxu0  ;;  %v4437_v41 = vpop.f32.mrb[12].mxu1 }
  0xf6   :  { %5223 = vst [vmem:[#allocation4_spill] sm:$0xff] %v4437_v41  ;;  %v4442_v43 = vpop.f32.mrb[13].mxu0  ;;  %v4450_v46 = vpop.f32.mrb[13].mxu1 }
  0xf7   :  { %5224 = vst [vmem:[#allocation5_spill] sm:$0xff] %v4450_v46  ;;  %v4454_v48 = vpop.f32.mrb[14].mxu0  ;;  %v4459_v50 = vpop.f32.mrb[14].mxu1 }
  0xf8   :  { %5225 = vst [vmem:[#allocation6_spill] sm:$0xff] %v4459_v50  ;;  %v4463_v52 = vpop.f32.mrb[15].mxu0  ;;  %v4465_v53 = vpop.f32.mrb[15].mxu1 }
  0xf9   :  { %5226 = vst [vmem:[#allocation7_spill] sm:$0xff] %v4465_v53 }
  0xfa   :  { %3524 = vmatmul.mubr.msk.bf16.gmra.mrb[120].mxu0 %vm932_vm2, %v3822_v44  ;;  %3656 = vmatmul.mubr.msk.bf16.gmra.mrb[120].mxu1 %vm932_vm2, %v3823_v45 }
  0xfb   :  { %3527 = vmatprep.mubr.msk.bf16.mxu0 %vm932_vm2, %v3824_v49 }
  0xfd   :  { %v3421_v55 = vpop.f32.mrb[16].mxu0  ;;  %v3553_v59 = vpop.f32.mrb[16].mxu1 }
  0xfe   :  { %v1422_v60 = vpop.f32.mrb[17].mxu0  ;;  %v1950_v0 = vpop.f32.mrb[17].mxu1 }
  0xff   :  { %v3422_v7 = vpop.f32.mrb[18].mxu0  ;;  %v3554_v8 = vpop.f32.mrb[18].mxu1 }
 0x100   :  { %v1425_v12 = vpop.f32.mrb[19].mxu0  ;;  %v1953_v21 = vpop.f32.mrb[19].mxu1 }
 0x102   :  { %3528 = vmatmul.mubr.msk.bf16.gmra.mrb[124].mxu0 %vm932_vm2, %v3825_v63 }
 0x103   :  { %3531 = vmatprep.mubr.msk.bf16.mxu0 %vm932_vm2, %v3826_v11 }
 0x105   :  { %v4480_v22 = vpop.f32.mrb[20].mxu0  ;;  %v4482_v25 = vpop.f32.mrb[20].mxu1 }
 0x106   :  { %5227 = vst [vmem:[#allocation8_spill] sm:$0xff] %v4482_v25  ;;  %v4484_v30 = vpop.f32.mrb[21].mxu0  ;;  %v4491_v37 = vpop.f32.mrb[21].mxu1 }
 0x107   :  { %5228 = vst [vmem:[#allocation9_spill] sm:$0xff] %v4491_v37  ;;  %v4493_v44 = vpop.f32.mrb[22].mxu0  ;;  %v4497_v49 = vpop.f32.mrb[22].mxu1 }
 0x108   :  { %5229 = vst [vmem:[#allocation10_spill] sm:$0xff] %v4497_v49  ;;  %v4499_v63 = vpop.f32.mrb[23].mxu0  ;;  %v4503_v20 = vpop.f32.mrb[23].mxu1 }
 0x109   :  { %5230 = vst [vmem:[#allocation11_spill] sm:$0xff] %v4503_v20 }
 0x10a   :  { %3532 = vmatmul.mubr.msk.bf16.gmra.mrb[128].mxu0 %vm932_vm2, %v3827_v32  ;;  %v2889_v32 = vld [vmem:[%s5207_s3 + $0x20] sm:$0xff] }
 0x10d   :  { %v3429_v54 = vpop.f32.mrb[24].mxu0  ;;  %v3561_v51 = vpop.f32.mrb[24].mxu1 }
 0x10e   :  { %v2447_v47 = vmax.f32 %v3421_v55, %v3429_v54  ;;  %v2483_v42 = vmax.f32 %v3553_v59, %v3561_v51  ;;  %v1454_v39 = vpop.f32.mrb[25].mxu0  ;;  %v1982_v45 = vpop.f32.mrb[25].mxu1 }
 0x10f   :  { %v2445_v38 = vmax.f32 %v1422_v60, %v1454_v39  ;;  %v2481_v35 = vmax.f32 %v1950_v0, %v1982_v45  ;;  %v3430_v33 = vpop.f32.mrb[26].mxu0  ;;  %v3562_v28 = vpop.f32.mrb[26].mxu1  ;;  %v2890_v45 = vld [vmem:[%s5207_s3 + $0x28] sm:$0xff] }
 0x110   :  { %v2511_v11 = vmax.f32 %v2383_v18, %v2447_v47  ;;  %v4519_v54 = vmax.f32 %v2419_v23, %v2483_v42  ;;  %v2448_v51 = vmax.f32 %v3422_v7, %v3430_v33  ;;  %v2484_v55 = vmax.f32 %v3554_v8, %v3562_v28  ;;  %v1457_v39 = vpop.f32.mrb[27].mxu0  ;;  %v1985_v59 = vpop.f32.mrb[27].mxu1 }
 0x111   :  { %v2509_v60 = vmax.f32 %v2381_v26, %v2445_v38  ;;  %v4527_v16 = vmax.f32 %v5232_v56, %v2481_v35  ;;  %v2446_v18 = vmax.f32 %v1425_v12, %v1457_v39  ;;  %v2482_v47 = vmax.f32 %v1953_v21, %v1985_v59 }
 0x112   :  { %5231 = vst [vmem:[#allocation12_spill] sm:$0xff] %v4519_v54  ;;  %v2512_v17 = vmax.f32 %v5234_v57, %v2448_v51  ;;  %v5235_v23 = vmax.f32 %v4339_v1, %v4408_v29  ;;  %v2582_v33 = vadd.f32 %v4514_v31, %v2511_v11  ;;  %v5240_v39 = vmax.f32 %v4349_v4, %v4435_v40 }
 0x113   :  { %5233 = vst [vmem:[#allocation13_spill] sm:$0xff] %v4527_v16  ;;  %v2580_v58 = vadd.f32 %v4514_v31, %v2509_v60  ;;  %v2510_v19 = vmax.f32 %v5237_v61, %v2446_v18  ;;  %v4545_v26 = vmax.f32 %v5238_v24, %v2482_v47  ;;  %v5241_v60 = vmax.f32 %v4353_v6, %v4442_v43 }
 0x114   :  { %v4535_v28 = vmax.f32 %v5235_v23, %v2484_v55  ;;  %v2583_v62 = vadd.f32 %v4514_v31, %v2512_v17  ;;  %v2646_v0 = vmax.f32 %v2582_v33, 0.0  ;;  %v3685_v18 = vpack.c.bf16 %v2890_v45, %v2889_v32 }
 0x115   :  { %5239 = vst [vmem:[#allocation15_spill] sm:$0xff] %v4545_v26  ;;  %v2644_v27 = vmax.f32 %v2580_v58, 0.0  ;;  %v2581_v1 = vadd.f32 %v4514_v31, %v2510_v19  ;;  %v3433_v29 = vpop.f32.mrb[28].mxu0  ;;  %v4549_v35 = vpop.f32.mrb[28].mxu1  ;;  %v5242_v57 = vmax.f32 %v4363_v10, %v4454_v48  ;;  %v5244_v10 = vmov 0.0|0.0  }
 0x116   :  { %5236 = vst [vmem:[#allocation14_spill] sm:$0xff] %v4535_v28  ;;  %v1470_v38 = vpop.f32.mrb[29].mxu0  ;;  %v4551_v42 = vpop.f32.mrb[29].mxu1  ;;  %v2647_v3 = vmax.f32 %v2583_v62, 0.0  ;;  %v2451_v36 = vmax.f32 %v4480_v22, %v3433_v29  ;;  %v2712_v47 = vsel %vm2708_vm3, %v2646_v0, 0.0  ;;  %3686 = vmatpush3.bf16.msra.mxu1 %v3685_v18 }
 0x117   :  { %v2645_v2 = vmax.f32 %v2581_v1, 0.0  ;;  %v3434_v34 = vpop.f32.mrb[30].mxu0  ;;  %v4553_v7 = vpop.f32.mrb[30].mxu1  ;;  %v2449_v8 = vmax.f32 %v4484_v30, %v1470_v38  ;;  %v2709_v11 = vsel %vm2708_vm3, %v2644_v27, 0.0  ;;  %3687 = vmatprep.subr.bf16.mxu1 %v5244_v10 }
 0x118   :  { %v1473_v12 = vpop.f32.mrb[31].mxu0  ;;  %v4557_v21 = vpop.f32.mrb[31].mxu1  ;;  %v2452_v55 = vmax.f32 %v4493_v44, %v3434_v34  ;;  %v2515_v59 = vmax.f32 %v5240_v39, %v2451_v36  ;;  %v5243_v44 = vmax.f32 %v4373_v14, %v4463_v52  ;;  %v2714_v6 = vsel %vm2708_vm3, %v2647_v3, 0.0 }
 0x119   :  { %v2710_v51 = vsel %vm2708_vm3, %v2645_v2, 0.0  ;;  %v2450_v22 = vmax.f32 %v4499_v63, %v1473_v12  ;;  %v2513_v56 = vmax.f32 %v5241_v60, %v2449_v8 }
 0x11a   :  { %v2711_v30 = vadd.f32 %v2710_v51, %v2709_v11  ;;  %v2516_v17 = vmax.f32 %v5242_v57, %v2452_v55  ;;  %v2586_v33 = vadd.f32 %v4514_v31, %v2515_v59 }
 0x11b   :  { %v2514_v63 = vmax.f32 %v5243_v44, %v2450_v22  ;;  %v2584_v4 = vadd.f32 %v4514_v31, %v2513_v56 }
 0x11c   :  { %v2713_v23 = vadd.f32 %v2712_v47, %v2711_v30  ;;  %v2587_v14 = vadd.f32 %v4514_v31, %v2516_v17  ;;  %v2650_v1 = vmax.f32 %v2586_v33, 0.0 }
 0x11d   :  { %v2585_v40 = vadd.f32 %v4514_v31, %v2514_v63  ;;  %v4586_v43 = vpop.f32.mrb[32].mxu0  ;;  %v4588_v58 = vpop.f32.mrb[32].mxu1  ;;  %v2648_v48 = vmax.f32 %v2584_v4, 0.0 }
 0x11e   :  { %v2715_v61 = vadd.f32 %v2714_v6, %v2713_v23  ;;  %v4592_v52 = vpop.f32.mrb[33].mxu0  ;;  %v4594_v19 = vpop.f32.mrb[33].mxu1  ;;  %v2651_v3 = vmax.f32 %v2587_v14, 0.0  ;;  %v2720_v8 = vsel %vm2708_vm3, %v2650_v1, 0.0 }
 0x11f   :  { %v2649_v24 = vmax.f32 %v2585_v40, 0.0  ;;  %v4596_v62 = vpop.f32.mrb[34].mxu0  ;;  %v4598_v27 = vpop.f32.mrb[34].mxu1  ;;  %v2716_v29 = vsel %vm2708_vm3, %v2648_v48, 0.0 }
 0x120   :  { %v4601_v38 = vpop.f32.mrb[35].mxu0  ;;  %v4603_v0 = vpop.f32.mrb[35].mxu1  ;;  %v2717_v2 = vadd.f32 %v2716_v29, %v2715_v61  ;;  %v2722_v11 = vsel %vm2708_vm3, %v2651_v3, 0.0 }
 0x121   :  { %v2718_v34 = vsel %vm2708_vm3, %v2649_v24, 0.0 }
 0x122   :  { %v2719_v36 = vadd.f32 %v2718_v34, %v2717_v2 }
 0x124   :  { %v2721_v12 = vadd.f32 %v2720_v8, %v2719_v36 }
 0x125   :  { %v4607_v32 = vpop.f32.mrb[36].mxu0  ;;  %v3573_v45 = vpop.f32.mrb[36].mxu1 }
 0x126   :  { %v4610_v51 = vpop.f32.mrb[37].mxu0  ;;  %v2423_v55 = vmax.f32 %v4549_v35, %v3573_v45  ;;  %v2030_v22 = vpop.f32.mrb[37].mxu1  ;;  %v4613_v30 = vadd.f32 %v2722_v11, %v2721_v12 }
 0x127   :  { %v4615_v39 = vpop.f32.mrb[38].mxu0  ;;  %v2421_v59 = vmax.f32 %v4551_v42, %v2030_v22  ;;  %v3574_v60 = vpop.f32.mrb[38].mxu1 }
 0x128   :  { %v4618_v56 = vpop.f32.mrb[39].mxu0  ;;  %v2424_v18 = vmax.f32 %v4553_v7, %v3574_v60  ;;  %v2033_v47 = vpop.f32.mrb[39].mxu1 }
 0x129   :  { %v2422_v57 = vmax.f32 %v4557_v21, %v2033_v47 }
 0x12d   :  { %v4622_v17 = vpop.f32.mrb[40].mxu0  ;;  %v4624_v44 = vpop.f32.mrb[40].mxu1 }
 0x12e   :  { %v4628_v63 = vpop.f32.mrb[41].mxu0  ;;  %v4632_v23 = vpop.f32.mrb[41].mxu1 }
 0x12f   :  { %v4636_v33 = vpop.f32.mrb[42].mxu0  ;;  %v4640_v4 = vpop.f32.mrb[42].mxu1 }
 0x130   :  { %v4644_v40 = vpop.f32.mrb[43].mxu0  ;;  %v4648_v48 = vpop.f32.mrb[43].mxu1 }
 0x135   :  { %v4654_v24 = vpop.f32.mrb[44].mxu0  ;;  %v3581_v1 = vpop.f32.mrb[44].mxu1 }
 0x136   :  { %v4658_v2 = vpop.f32.mrb[45].mxu0  ;;  %v2062_v34 = vpop.f32.mrb[45].mxu1 }
 0x137   :  { %v4662_v36 = vpop.f32.mrb[46].mxu0  ;;  %v3582_v8 = vpop.f32.mrb[46].mxu1 }
 0x138   :  { %v4666_v45 = vpop.f32.mrb[47].mxu0  ;;  %v2065_v11 = vpop.f32.mrb[47].mxu1 }
 0x13d   :  { %v3453_v60 = vpop.f32.mrb[48].mxu0  ;;  %v3585_v47 = vpop.f32.mrb[48].mxu1 }
 0x13e   :  { %v1550_v29 = vpop.f32.mrb[49].mxu0  ;;  %v2078_v14 = vpop.f32.mrb[49].mxu1 }
 0x13f   :  { %v3454_v61 = vpop.f32.mrb[50].mxu0  ;;  %v3586_v10 = vpop.f32.mrb[50].mxu1 }
 0x140   :  { %v1553_v6 = vpop.f32.mrb[51].mxu0  ;;  %v4670_v3 = vpop.f32.mrb[51].mxu1 }
 0x145   :  { %v4672_v21 = vpop.f32.mrb[52].mxu0  ;;  %v3589_v7 = vpop.f32.mrb[52].mxu1 }
 0x146   :  { %v2487_v42 = vmax.f32 %v3581_v1, %v3589_v7  ;;  %v4674_v12 = vpop.f32.mrb[53].mxu0  ;;  %v2094_v35 = vpop.f32.mrb[53].mxu1 }
 0x147   :  { %v2485_v28 = vmax.f32 %v2062_v34, %v2094_v35  ;;  %v4676_v54 = vpop.f32.mrb[54].mxu0  ;;  %v3590_v22 = vpop.f32.mrb[54].mxu1 }
 0x148   :  { %v2551_v26 = vmax.f32 %v2423_v55, %v2487_v42  ;;  %v2488_v16 = vmax.f32 %v3582_v8, %v3590_v22  ;;  %v4678_v20 = vpop.f32.mrb[55].mxu0  ;;  %v2097_v53 = vpop.f32.mrb[55].mxu1 }
 0x149   :  { %v2549_v49 = vmax.f32 %v2421_v59, %v2485_v28  ;;  %v2486_v50 = vmax.f32 %v2065_v11, %v2097_v53 }
 0x14a   :  { %v2622_v15 = vadd.f32 %v4514_v31, %v2551_v26  ;;  %v2552_v13 = vmax.f32 %v2424_v18, %v2488_v16 }
 0x14b   :  { %v2620_v37 = vadd.f32 %v4514_v31, %v2549_v49  ;;  %v2550_v7 = vmax.f32 %v2422_v57, %v2486_v50  ;;  %v5246_v49 = vmax.f32 %v4588_v58, %v4624_v44  ;;  %v5249_v58 = vmax.f32 %v4596_v62, %v4636_v33 }
 0x14c   :  { %v2623_v1 = vadd.f32 %v4514_v31, %v2552_v13  ;;  %v2686_v55 = vmax.f32 %v2622_v15, 0.0  ;;  %v5245_v13 = vmax.f32 %v4586_v43, %v4622_v17  ;;  %v5251_v62 = vmax.f32 %v4601_v38, %v4644_v40  ;;  %v2891_v38 = vld [vmem:[%s5207_s3 + $0x30] sm:$0xff]  ;;  %v2892_v40 = vld [vmem:[%s5207_s3 + $0x38] sm:$0xff] }
 0x14d   :  { %v2684_v46 = vmax.f32 %v2620_v37, 0.0  ;;  %v2621_v35 = vadd.f32 %v4514_v31, %v2550_v7  ;;  %v3461_v34 = vpop.f32.mrb[56].mxu0  ;;  %v3593_v25 = vpop.f32.mrb[56].mxu1 }
 0x14e   :  { %v2455_v42 = vmax.f32 %v3453_v60, %v3461_v34  ;;  %v2491_v8 = vmax.f32 %v3585_v47, %v3593_v25  ;;  %v1582_v22 = vpop.f32.mrb[57].mxu0  ;;  %v2110_v41 = vpop.f32.mrb[57].mxu1  ;;  %v2687_v28 = vmax.f32 %v2623_v1, 0.0  ;;  %v2817_v43 = vsel %vm2708_vm3, %v2686_v55, 0.0 }
 0x14f   :  { %v2685_v53 = vmax.f32 %v2621_v35, 0.0  ;;  %v2453_v59 = vmax.f32 %v1550_v29, %v1582_v22  ;;  %v2489_v26 = vmax.f32 %v2078_v14, %v2110_v41  ;;  %v3462_v16 = vpop.f32.mrb[58].mxu0  ;;  %v3594_v18 = vpop.f32.mrb[58].mxu1  ;;  %v2814_v50 = vsel %vm2708_vm3, %v2684_v46, 0.0 }
 0x150   :  { %v2519_v37 = vmax.f32 %v5245_v13, %v2455_v42  ;;  %v2555_v15 = vmax.f32 %v5246_v49, %v2491_v8  ;;  %v2456_v57 = vmax.f32 %v3454_v61, %v3462_v16  ;;  %v1585_v25 = vpop.f32.mrb[59].mxu0  ;;  %v2113_v11 = vpop.f32.mrb[59].mxu1  ;;  %v5247_v41 = vmax.f32 %v4592_v52, %v4628_v63 }
 0x151   :  { %v2815_v60 = vsel %vm2708_vm3, %v2685_v53, 0.0  ;;  %v5248_v46 = vmax.f32 %v4594_v19, %v4632_v23  ;;  %v2492_v47 = vmax.f32 %v3586_v10, %v3594_v18  ;;  %v5250_v52 = vmax.f32 %v4598_v27, %v4640_v4 }
 0x152   :  { %v2517_v14 = vmax.f32 %v5247_v41, %v2453_v59  ;;  %v2816_v17 = vadd.f32 %v2815_v60, %v2814_v50  ;;  %v2520_v44 = vmax.f32 %v5249_v58, %v2456_v57  ;;  %v2454_v1 = vmax.f32 %v1553_v6, %v1585_v25 }
 0x153   :  { %v2553_v29 = vmax.f32 %v5248_v46, %v2489_v26  ;;  %v2556_v63 = vmax.f32 %v5250_v52, %v2492_v47  ;;  %v2590_v19 = vadd.f32 %v4514_v31, %v2519_v37  ;;  %v2819_v23 = vsel %vm2708_vm3, %v2687_v28, 0.0 }
 0x154   :  { %v2588_v61 = vadd.f32 %v4514_v31, %v2517_v14  ;;  %v2818_v35 = vadd.f32 %v2817_v43, %v2816_v17  ;;  %v2591_v34 = vadd.f32 %v4514_v31, %v2520_v44  ;;  %v2518_v33 = vmax.f32 %v5251_v62, %v2454_v1 }
 0x155   :  { %v2624_v7 = vadd.f32 %v4514_v31, %v2553_v29  ;;  %v3465_v55 = vpop.f32.mrb[60].mxu0  ;;  %v4713_v42 = vpop.f32.mrb[60].mxu1  ;;  %v2626_v4 = vadd.f32 %v4514_v31, %v2555_v15  ;;  %v2654_v16 = vmax.f32 %v2590_v19, 0.0  ;;  %v2490_v50 = vmax.f32 %v4670_v3, %v2113_v11 }
 0x156   :  { %v2820_v8 = vadd.f32 %v2819_v23, %v2818_v35  ;;  %v1598_v22 = vpop.f32.mrb[61].mxu0  ;;  %v4715_v27 = vpop.f32.mrb[61].mxu1  ;;  %v2652_v6 = vmax.f32 %v2588_v61, 0.0  ;;  %v2589_v28 = vadd.f32 %v4514_v31, %v2518_v33  ;;  %v2459_v13 = vmax.f32 %v4672_v21, %v3465_v55 }
 0x157   :  { %v2688_v10 = vmax.f32 %v2624_v7, 0.0  ;;  %v3466_v59 = vpop.f32.mrb[62].mxu0  ;;  %v4720_v26 = vpop.f32.mrb[62].mxu1  ;;  %v2655_v15 = vmax.f32 %v2591_v34, 0.0  ;;  %v2457_v25 = vmax.f32 %v4674_v12, %v1598_v22  ;;  %v5252_v41 = vmax.f32 %v4603_v0, %v4648_v48 }
 0x158   :  { %v1601_v37 = vpop.f32.mrb[63].mxu0  ;;  %v4730_v49 = vpop.f32.mrb[63].mxu1  ;;  %v2653_v57 = vmax.f32 %v2589_v28, 0.0  ;;  %v2460_v60 = vmax.f32 %v4676_v54, %v3466_v59  ;;  %v5253_v46 = vmax.f32 %v4607_v32, %v4654_v24  ;;  %v3688_v21 = vpack.c.bf16 %v2892_v40, %v2891_v38 }
 0x159   :  { %v2821_v53 = vsel %vm2708_vm3, %v2688_v10, 0.0  ;;  %v2554_v14 = vmax.f32 %v5252_v41, %v2490_v50  ;;  %v2458_v3 = vmax.f32 %v4678_v20, %v1601_v37  ;;  %v2730_v11 = vsel %vm2708_vm3, %v2652_v6, 0.0 }
 0x15a   :  { %v2822_v18 = vadd.f32 %v2821_v53, %v2820_v8  ;;  %v2523_v29 = vmax.f32 %v5253_v46, %v2459_v13  ;;  %v2731_v47 = vsel %vm2708_vm3, %v2653_v57, 0.0  ;;  %v5254_v12 = vmax.f32 %v4610_v51, %v4658_v2  ;;  %3689 = vmatpush3.bf16.msra.mxu1 %v3688_v21 }
 0x15b   :  { %v5255_v54 = vmax.f32 %v4615_v39, %v4662_v36  ;;  %v2627_v48 = vadd.f32 %v4514_v31, %v2556_v63  ;;  %v2732_v17 = vadd.f32 %v2731_v47, %v2730_v11  ;;  %v2625_v32 = vadd.f32 %v4514_v31, %v2554_v14 }
 0x15c   :  { %v2521_v43 = vmax.f32 %v5254_v12, %v2457_v25  ;;  %v5256_v20 = vmax.f32 %v4618_v56, %v4666_v45  ;;  %v2724_v58 = vrot.slane %v4613_v30, 4  ;;  %v2733_v44 = vsel %vm2708_vm3, %v2654_v16, 0.0 }
 0x15d   :  { %v2524_v0 = vmax.f32 %v5255_v54, %v2460_v60  ;;  %v2594_v51 = vadd.f32 %v4514_v31, %v2523_v29  ;;  %v4758_v39 = vpop.f32.mrb[64].mxu0  ;;  %v4760_v36 = vpop.f32.mrb[64].mxu1  ;;  %v2690_v61 = vmax.f32 %v2626_v4, 0.0  ;;  %v2734_v7 = vadd.f32 %v2733_v44, %v2732_v17 }
 0x15e   :  { %v2522_v24 = vmax.f32 %v5256_v20, %v2458_v3  ;;  %v2592_v2 = vadd.f32 %v4514_v31, %v2521_v43  ;;  %v2689_v52 = vmax.f32 %v2625_v32, 0.0  ;;  %v4763_v56 = vpop.f32.mrb[65].mxu0  ;;  %v4765_v45 = vpop.f32.mrb[65].mxu1  ;;  %v2735_v1 = vsel %vm2708_vm3, %v2655_v15, 0.0 }
 0x15f   :  { %v2595_v19 = vadd.f32 %v4514_v31, %v2524_v0  ;;  %v4769_v23 = vpop.f32.mrb[66].mxu0  ;;  %v4771_v10 = vpop.f32.mrb[66].mxu1  ;;  %v2691_v34 = vmax.f32 %v2627_v48, 0.0  ;;  %v2736_v33 = vadd.f32 %v2735_v1, %v2734_v7  ;;  %v2658_v6 = vmax.f32 %v2594_v51, 0.0 }
 0x160   :  { %v2593_v63 = vadd.f32 %v4514_v31, %v2522_v24  ;;  %v2656_v35 = vmax.f32 %v2592_v2, 0.0  ;;  %v2823_v62 = vsel %vm2708_vm3, %v2689_v52, 0.0  ;;  %v4774_v8 = vpop.f32.mrb[67].mxu0  ;;  %v4776_v22 = vpop.f32.mrb[67].mxu1  ;;  %v2725_v28 = vadd.f32 %v2724_v58, %v4613_v30 }
 0x161   :  { %v2824_v4 = vadd.f32 %v2823_v62, %v2822_v18  ;;  %v2825_v59 = vsel %vm2708_vm3, %v2690_v61, 0.0  ;;  %v2659_v50 = vmax.f32 %v2595_v19, 0.0  ;;  %v2827_v13 = vsel %vm2708_vm3, %v2691_v34, 0.0 }
 0x162   :  { %v2657_v55 = vmax.f32 %v2593_v63, 0.0  ;;  %v2737_v53 = vsel %vm2708_vm3, %v2656_v35, 0.0  ;;  %v2741_v57 = vsel %vm2708_vm3, %v2658_v6, 0.0  ;;  %v2726_v60 = vrot.slane %v2725_v28, 2 }
 0x163   :  { %v2738_v38 = vadd.f32 %v2737_v53, %v2736_v33  ;;  %v2826_v16 = vadd.f32 %v2825_v59, %v2824_v4  ;;  %v2743_v29 = vsel %vm2708_vm3, %v2659_v50, 0.0 }
 0x164   :  { %v2739_v40 = vsel %vm2708_vm3, %v2657_v55, 0.0  ;;  %v2727_v48 = vadd.f32 %v2726_v60, %v2725_v28 }
 0x165   :  { %v2740_v37 = vadd.f32 %v2739_v40, %v2738_v38  ;;  %v4783_v15 = vadd.f32 %v2827_v13, %v2826_v16  ;;  %v4786_v18 = vpop.f32.mrb[68].mxu0  ;;  %v4788_v25 = vpop.f32.mrb[68].mxu1  ;;  %v3832_v13 = vmov 0.0  }
 0x166   :  { %v4790_v41 = vpop.f32.mrb[69].mxu0  ;;  %v2431_v14 = vmax.f32 %v4713_v42, %v4788_v25  ;;  %v4794_v46 = vpop.f32.mrb[69].mxu1  ;;  %v2728_v58 = vrot.slane %v2727_v48, 1  ;;  %3675 = vmatprep.mubr.msk.f32.mxu1 %vm3831_vm5, %v3832_v13 }
 0x167   :  { %5257 = vst [vmem:[#allocation16_spill] sm:$0xff] %v4783_v15  ;;  %v2742_v30 = vadd.f32 %v2741_v57, %v2740_v37  ;;  %v4797_v3 = vpop.f32.mrb[70].mxu0  ;;  %v2429_v21 = vmax.f32 %v4715_v27, %v4794_v46  ;;  %v4801_v11 = vpop.f32.mrb[70].mxu1 }
 0x168   :  { %v4803_v12 = vpop.f32.mrb[71].mxu0  ;;  %v4807_v54 = vpop.f32.mrb[71].mxu1  ;;  %v2729_v53 = vadd.f32 %v2728_v58, %v2727_v48 }
 0x169   :  { %v2744_v47 = vadd.f32 %v2743_v29, %v2742_v30  ;;  %v5259_v42 = vmax.f32 %v4730_v49, %v4807_v54 }
 0x16a   :  { %v2877_v16 = vmul.f32 0.015625, %v2729_v53 }
 0x16b   :  { %v2745_v17 = vrot.slane %v2744_v47, 4 }
 0x16d   :  { %v2746_v32 = vadd.f32 %v2745_v17, %v2744_v47  ;;  %v4811_v20 = vpop.f32.mrb[72].mxu0  ;;  %v4813_v24 = vpop.f32.mrb[72].mxu1 }
 0x16e   :  { %v4817_v2 = vpop.f32.mrb[73].mxu0  ;;  %v4821_v7 = vpop.f32.mrb[73].mxu1 }
 0x16f   :  { %v2747_v44 = vrot.slane %v2746_v32, 2  ;;  %v4825_v63 = vpop.f32.mrb[74].mxu0  ;;  %v4829_v35 = vpop.f32.mrb[74].mxu1 }
 0x170   :  { %v4833_v62 = vpop.f32.mrb[75].mxu0  ;;  %v4837_v55 = vpop.f32.mrb[75].mxu1 }
 0x171   :  { %v2748_v19 = vadd.f32 %v2747_v44, %v2746_v32 }
 0x173   :  { %v2749_v28 = vrot.slane %v2748_v19, 1 }
 0x175   :  { %v2750_v59 = vadd.f32 %v2749_v28, %v2748_v19  ;;  %v4843_v38 = vpop.f32.mrb[76].mxu0  ;;  %v3613_v40 = vpop.f32.mrb[76].mxu1 }
 0x176   :  { %v4847_v37 = vpop.f32.mrb[77].mxu0  ;;  %v2190_v57 = vpop.f32.mrb[77].mxu1 }
 0x177   :  { %v2878_v50 = vmul.f32 0.015625, %v2750_v59  ;;  %v4851_v30 = vpop.f32.mrb[78].mxu0  ;;  %v3614_v29 = vpop.f32.mrb[78].mxu1 }
 0x178   :  { %v4855_v48 = vpop.f32.mrb[79].mxu0  ;;  %v2193_v17 = vpop.f32.mrb[79].mxu1 }
 0x179   :  { %v4857_v32 = vsel %vm2908_vm4, %v2878_v50, %v2877_v16 }
 0x17d   :  { %v3485_v44 = vpop.f32.mrb[80].mxu0  ;;  %v3617_v19 = vpop.f32.mrb[80].mxu1 }
 0x17e   :  { %v1678_v53 = vpop.f32.mrb[81].mxu0  ;;  %v2206_v28 = vpop.f32.mrb[81].mxu1 }
 0x17f   :  { %v3486_v59 = vpop.f32.mrb[82].mxu0  ;;  %v3618_v60 = vpop.f32.mrb[82].mxu1 }
 0x180   :  { %v1681_v6 = vpop.f32.mrb[83].mxu0  ;;  %v4861_v4 = vpop.f32.mrb[83].mxu1 }
 0x185   :  { %v4863_v47 = vpop.f32.mrb[84].mxu0  ;;  %v3621_v33 = vpop.f32.mrb[84].mxu1 }
 0x186   :  { %v2495_v16 = vmax.f32 %v3613_v40, %v3621_v33  ;;  %v4865_v50 = vpop.f32.mrb[85].mxu0  ;;  %v2222_v34 = vpop.f32.mrb[85].mxu1 }
 0x187   :  { %v2493_v58 = vmax.f32 %v2190_v57, %v2222_v34  ;;  %v4867_v1 = vpop.f32.mrb[86].mxu0  ;;  %v3622_v52 = vpop.f32.mrb[86].mxu1  ;;  %v5258_v34 = vmax.f32 %v4720_v26, %v4801_v11 }
 0x188   :  { %v2559_v61 = vmax.f32 %v2431_v14, %v2495_v16  ;;  %v2496_v51 = vmax.f32 %v3614_v29, %v3622_v52  ;;  %v4872_v13 = vpop.f32.mrb[87].mxu0  ;;  %v2225_v0 = vpop.f32.mrb[87].mxu1 }
 0x189   :  { %v2557_v43 = vmax.f32 %v2429_v21, %v2493_v58  ;;  %v2494_v33 = vmax.f32 %v2193_v17, %v2225_v0 }
 0x18a   :  { %v2630_v40 = vadd.f32 %v4514_v31, %v2559_v61  ;;  %v2560_v57 = vmax.f32 %v5258_v34, %v2496_v51 }
 0x18b   :  { %v2628_v15 = vadd.f32 %v4514_v31, %v2557_v43  ;;  %v2558_v25 = vmax.f32 %v5259_v42, %v2494_v33  ;;  %v5261_v33 = vmax.f32 %v4760_v36, %v4813_v24  ;;  %v5264_v36 = vmax.f32 %v4769_v23, %v4825_v63 }
 0x18c   :  { %v2631_v14 = vadd.f32 %v4514_v31, %v2560_v57  ;;  %v2694_v21 = vmax.f32 %v2630_v40, 0.0 }
 0x18d   :  { %v2692_v52 = vmax.f32 %v2628_v15, 0.0  ;;  %v2629_v29 = vadd.f32 %v4514_v31, %v2558_v25  ;;  %v3493_v27 = vpop.f32.mrb[88].mxu0  ;;  %v3625_v46 = vpop.f32.mrb[88].mxu1  ;;  %v5260_v15 = vmax.f32 %v4758_v39, %v4811_v20  ;;  %v5263_v25 = vmax.f32 %v4765_v45, %v4821_v7 }
 0x18e   :  { %v2463_v0 = vmax.f32 %v3485_v44, %v3493_v27  ;;  %v2499_v61 = vmax.f32 %v3617_v19, %v3625_v46  ;;  %v1710_v17 = vpop.f32.mrb[89].mxu0  ;;  %v2238_v58 = vpop.f32.mrb[89].mxu1  ;;  %v2695_v26 = vmax.f32 %v2631_v14, 0.0  ;;  %v2838_v39 = vsel %vm2708_vm3, %v2694_v21, 0.0 }
 0x18f   :  { %v2693_v11 = vmax.f32 %v2629_v29, 0.0  ;;  %v2461_v51 = vmax.f32 %v1678_v53, %v1710_v17  ;;  %v2497_v43 = vmax.f32 %v2206_v28, %v2238_v58  ;;  %v3494_v16 = vpop.f32.mrb[90].mxu0  ;;  %v3626_v34 = vpop.f32.mrb[90].mxu1  ;;  %v2835_v49 = vsel %vm2708_vm3, %v2692_v52, 0.0 }
 0x190   :  { %v2527_v54 = vmax.f32 %v5260_v15, %v2463_v0  ;;  %v2563_v40 = vmax.f32 %v5261_v33, %v2499_v61  ;;  %v2464_v44 = vmax.f32 %v3486_v59, %v3494_v16  ;;  %v1713_v19 = vpop.f32.mrb[91].mxu0  ;;  %v2241_v57 = vpop.f32.mrb[91].mxu1  ;;  %v5262_v53 = vmax.f32 %v4763_v56, %v4817_v2 }
 0x191   :  { %v2836_v42 = vsel %vm2708_vm3, %v2693_v11, 0.0  ;;  %v2561_v14 = vmax.f32 %v5263_v25, %v2497_v43  ;;  %v2500_v52 = vmax.f32 %v3618_v60, %v3626_v34  ;;  %v5265_v56 = vmax.f32 %v4771_v10, %v4829_v35 }
 0x192   :  { %v2525_v28 = vmax.f32 %v5262_v53, %v2461_v51  ;;  %v2837_v20 = vadd.f32 %v2836_v42, %v2835_v49  ;;  %v2528_v24 = vmax.f32 %v5264_v36, %v2464_v44  ;;  %v2462_v27 = vmax.f32 %v1681_v6, %v1713_v19 }
 0x193   :  { %v2632_v29 = vadd.f32 %v4514_v31, %v2561_v14  ;;  %v2564_v2 = vmax.f32 %v5265_v56, %v2500_v52  ;;  %v2840_v45 = vsel %vm2708_vm3, %v2695_v26, 0.0  ;;  %v2598_v7 = vadd.f32 %v4514_v31, %v2527_v54 }
 0x194   :  { %v2596_v59 = vadd.f32 %v4514_v31, %v2525_v28  ;;  %v2839_v46 = vadd.f32 %v2838_v39, %v2837_v20  ;;  %v5266_v21 = vmax.f32 %v4774_v8, %v4833_v62  ;;  %v2599_v17 = vadd.f32 %v4514_v31, %v2528_v24 }
 0x195   :  { %v2696_v60 = vmax.f32 %v2632_v29, 0.0  ;;  %v3497_v63 = vpop.f32.mrb[92].mxu0  ;;  %v4915_v0 = vpop.f32.mrb[92].mxu1  ;;  %v2634_v8 = vadd.f32 %v4514_v31, %v2563_v40  ;;  %v2498_v43 = vmax.f32 %v4861_v4, %v2241_v57  ;;  %v2662_v15 = vmax.f32 %v2598_v7, 0.0 }
 0x196   :  { %v2526_v23 = vmax.f32 %v5266_v21, %v2462_v27  ;;  %v2841_v61 = vadd.f32 %v2840_v45, %v2839_v46  ;;  %v1726_v58 = vpop.f32.mrb[93].mxu0  ;;  %v4918_v10 = vpop.f32.mrb[93].mxu1  ;;  %v2660_v35 = vmax.f32 %v2596_v59, 0.0  ;;  %v2467_v16 = vmax.f32 %v4863_v47, %v3497_v63 }
 0x197   :  { %v2842_v6 = vsel %vm2708_vm3, %v2696_v60, 0.0  ;;  %v3498_v11 = vpop.f32.mrb[94].mxu0  ;;  %v4922_v51 = vpop.f32.mrb[94].mxu1  ;;  %v2465_v33 = vmax.f32 %v4865_v50, %v1726_v58  ;;  %v2663_v19 = vmax.f32 %v2599_v17, 0.0  ;;  %v5267_v42 = vmax.f32 %v4776_v22, %v4837_v55 }
 0x198   :  { %v2597_v26 = vadd.f32 %v4514_v31, %v2526_v23  ;;  %v2843_v62 = vadd.f32 %v2842_v6, %v2841_v61  ;;  %v1729_v34 = vpop.f32.mrb[95].mxu0  ;;  %v4927_v49 = vpop.f32.mrb[95].mxu1  ;;  %v2468_v44 = vmax.f32 %v4867_v1, %v3498_v11  ;;  %v5268_v40 = vmax.f32 %v4786_v18, %v4843_v38 }
 0x199   :  { %v2562_v53 = vmax.f32 %v5267_v42, %v2498_v43  ;;  %v2466_v47 = vmax.f32 %v4872_v13, %v1729_v34  ;;  %v2751_v57 = vsel %vm2708_vm3, %v2660_v35, 0.0  ;;  %v5269_v50 = vmax.f32 %v4790_v41, %v4847_v37 }
 0x19a   :  { %v2661_v54 = vmax.f32 %v2597_v26, 0.0  ;;  %v2531_v4 = vmax.f32 %v5268_v40, %v2467_v16  ;;  %v5270_v1 = vmax.f32 %v4797_v3, %v4851_v30  ;;  %v2635_v22 = vadd.f32 %v4514_v31, %v2564_v2 }
 0x19b   :  { %v2529_v25 = vmax.f32 %v5269_v50, %v2465_v33  ;;  %v2633_v18 = vadd.f32 %v4514_v31, %v2562_v53  ;;  %v5271_v38 = vmax.f32 %v4803_v12, %v4855_v48  ;;  %v2754_v52 = vsel %vm2708_vm3, %v2662_v15, 0.0 }
 0x19c   :  { %v2752_v28 = vsel %vm2708_vm3, %v2661_v54, 0.0  ;;  %v2532_v14 = vmax.f32 %v5270_v1, %v2468_v44  ;;  %v2602_v39 = vadd.f32 %v4514_v31, %v2531_v4  ;;  %v2698_v3 = vmax.f32 %v2634_v8, 0.0 }
 0x19d   :  { %v2753_v55 = vadd.f32 %v2752_v28, %v2751_v57  ;;  %v2530_v13 = vmax.f32 %v5271_v38, %v2466_v47  ;;  %v2600_v41 = vadd.f32 %v4514_v31, %v2529_v25  ;;  %v4954_v37 = vpop.f32.mrb[96].mxu0  ;;  %v4956_v20 = vpop.f32.mrb[96].mxu1  ;;  %v2697_v36 = vmax.f32 %v2633_v18, 0.0 }
 0x19e   :  { %v4959_v59 = vpop.f32.mrb[97].mxu0  ;;  %v4961_v29 = vpop.f32.mrb[97].mxu1  ;;  %v2756_v12 = vsel %vm2708_vm3, %v2663_v19, 0.0  ;;  %v2603_v56 = vadd.f32 %v4514_v31, %v2532_v14  ;;  %v2699_v46 = vmax.f32 %v2635_v22, 0.0  ;;  %v2666_v61 = vmax.f32 %v2602_v39, 0.0 }
 0x19f   :  { %v2755_v30 = vadd.f32 %v2754_v52, %v2753_v55  ;;  %v2601_v24 = vadd.f32 %v4514_v31, %v2530_v13  ;;  %v2664_v48 = vmax.f32 %v2600_v41, 0.0  ;;  %v4965_v2 = vpop.f32.mrb[98].mxu0  ;;  %v4967_v27 = vpop.f32.mrb[98].mxu1  ;;  %v2844_v45 = vsel %vm2708_vm3, %v2697_v36, 0.0 }
 0x1a0   :  { %v4970_v21 = vpop.f32.mrb[99].mxu0  ;;  %v4972_v23 = vpop.f32.mrb[99].mxu1  ;;  %v2845_v63 = vadd.f32 %v2844_v45, %v2843_v62  ;;  %v2846_v58 = vsel %vm2708_vm3, %v2698_v3, 0.0  ;;  %v2667_v26 = vmax.f32 %v2603_v56, 0.0  ;;  %v2848_v11 = vsel %vm2708_vm3, %v2699_v46, 0.0 }
 0x1a1   :  { %v2757_v7 = vadd.f32 %v2756_v12, %v2755_v30  ;;  %v2665_v60 = vmax.f32 %v2601_v24, 0.0  ;;  %v2758_v17 = vsel %vm2708_vm3, %v2664_v48, 0.0  ;;  %v2762_v16 = vsel %vm2708_vm3, %v2666_v61, 0.0 }
 0x1a2   :  { %v2847_v6 = vadd.f32 %v2846_v58, %v2845_v63  ;;  %v2764_v19 = vsel %vm2708_vm3, %v2667_v26, 0.0 }
 0x1a3   :  { %v2759_v31 = vadd.f32 %v2758_v17, %v2757_v7  ;;  %v2760_v35 = vsel %vm2708_vm3, %v2665_v60, 0.0 }
 0x1a4   :  { %v4978_v43 = vadd.f32 %v2848_v11, %v2847_v6 }
 0x1a5   :  { %v2761_v8 = vadd.f32 %v2760_v35, %v2759_v31  ;;  %v4981_v34 = vpop.f32.mrb[100].mxu0  ;;  %v4983_v62 = vpop.f32.mrb[100].mxu1 }
 0x1a6   :  { %v4985_v54 = vpop.f32.mrb[101].mxu0  ;;  %v2439_v33 = vmax.f32 %v4915_v0, %v4983_v62  ;;  %v4989_v44 = vpop.f32.mrb[101].mxu1 }
 0x1a7   :  { %v2763_v15 = vadd.f32 %v2762_v16, %v2761_v8  ;;  %v4992_v42 = vpop.f32.mrb[102].mxu0  ;;  %v2437_v53 = vmax.f32 %v4918_v10, %v4989_v44  ;;  %v4996_v40 = vpop.f32.mrb[102].mxu1 }
 0x1a8   :  { %v4998_v47 = vpop.f32.mrb[103].mxu0  ;;  %v2440_v57 = vmax.f32 %v4922_v51, %v4996_v40  ;;  %v5002_v28 = vpop.f32.mrb[103].mxu1 }
 0x1a9   :  { %v2765_v4 = vadd.f32 %v2764_v19, %v2763_v15 }
 0x1ab   :  { %v2766_v25 = vrot.slane %v2765_v4, 4 }
 0x1ad   :  { %v2767_v1 = vadd.f32 %v2766_v25, %v2765_v4  ;;  %v5006_v14 = vpop.f32.mrb[104].mxu0  ;;  %v5008_v22 = vpop.f32.mrb[104].mxu1 }
 0x1ae   :  { %v5012_v38 = vpop.f32.mrb[105].mxu0  ;;  %v5016_v52 = vpop.f32.mrb[105].mxu1 }
 0x1af   :  { %v2768_v55 = vrot.slane %v2767_v1, 2  ;;  %v5020_v41 = vpop.f32.mrb[106].mxu0  ;;  %v5024_v30 = vpop.f32.mrb[106].mxu1 }
 0x1b0   :  { %v5028_v12 = vpop.f32.mrb[107].mxu0  ;;  %v5032_v56 = vpop.f32.mrb[107].mxu1 }
 0x1b1   :  { %v2769_v36 = vadd.f32 %v2768_v55, %v2767_v1 }
 0x1b3   :  { %v2770_v7 = vrot.slane %v2769_v36, 1 }
 0x1b5   :  { %v2771_v60 = vadd.f32 %v2770_v7, %v2769_v36  ;;  %v5038_v63 = vpop.f32.mrb[108].mxu0  ;;  %v3645_v61 = vpop.f32.mrb[108].mxu1 }
 0x1b6   :  { %v5042_v31 = vpop.f32.mrb[109].mxu0  ;;  %v2318_v35 = vpop.f32.mrb[109].mxu1 }
 0x1b7   :  { %v2879_v17 = vmul.f32 0.015625, %v2771_v60  ;;  %v5046_v26 = vpop.f32.mrb[110].mxu0  ;;  %v3646_v11 = vpop.f32.mrb[110].mxu1 }
 0x1b8   :  { %v5050_v16 = vpop.f32.mrb[111].mxu0  ;;  %v2321_v15 = vpop.f32.mrb[111].mxu1 }
 0x1b9   :  { %v5053_v19 = vsel %vm2910_vm6, %v2879_v17, %v4857_v32 }
 0x1ba   :  { %5272 = vst [vmem:[#allocation17_spill] sm:$0xff] %v5053_v19 }
 0x1bd   :  { %v3517_v25 = vpop.f32.mrb[112].mxu0  ;;  %v3649_v1 = vpop.f32.mrb[112].mxu1 }
 0x1be   :  { %v1806_v55 = vpop.f32.mrb[113].mxu0  ;;  %v2334_v36 = vpop.f32.mrb[113].mxu1 }
 0x1bf   :  { %v3518_v7 = vpop.f32.mrb[114].mxu0  ;;  %v3650_v60 = vpop.f32.mrb[114].mxu1 }
 0x1c0   :  { %v1809_v6 = vpop.f32.mrb[115].mxu0  ;;  %v5057_v58 = vpop.f32.mrb[115].mxu1 }
 0x1c5   :  { %v5059_v45 = vpop.f32.mrb[116].mxu0  ;;  %v3653_v8 = vpop.f32.mrb[116].mxu1 }
 0x1c6   :  { %v2503_v46 = vmax.f32 %v3645_v61, %v3653_v8  ;;  %v5061_v48 = vpop.f32.mrb[117].mxu0  ;;  %v2350_v32 = vpop.f32.mrb[117].mxu1 }
 0x1c7   :  { %v2501_v17 = vmax.f32 %v2318_v35, %v2350_v32  ;;  %v5063_v24 = vpop.f32.mrb[118].mxu0  ;;  %v3654_v4 = vpop.f32.mrb[118].mxu1  ;;  %v5076_v35 = vld [vmem:[%s5208_s2] ss:$0 sm:$0xff] }
 0x1c8   :  { %v2567_v3 = vmax.f32 %v2439_v33, %v2503_v46  ;;  %v2504_v39 = vmax.f32 %v3646_v11, %v3654_v4  ;;  %v5068_v13 = vpop.f32.mrb[119].mxu0  ;;  %v2353_v18 = vpop.f32.mrb[119].mxu1  ;;  %v5273_v33 = vmax.f32 %v4927_v49, %v5002_v28  ;;  %v5274_v28 = vmax.f32 %v4954_v37, %v5006_v14 }
 0x1c9   :  { %v2565_v50 = vmax.f32 %v2437_v53, %v2501_v17  ;;  %v2502_v61 = vmax.f32 %v2321_v15, %v2353_v18 }
 0x1ca   :  { %v2638_v8 = vadd.f32 %v5076_v35, %v2567_v3  ;;  %v2568_v0 = vmax.f32 %v2440_v57, %v2504_v39 }
 0x1cb   :  { %v2636_v62 = vadd.f32 %v5076_v35, %v2565_v50  ;;  %v2566_v46 = vmax.f32 %v5273_v33, %v2502_v61 }
 0x1cc   :  { %v2639_v10 = vadd.f32 %v5076_v35, %v2568_v0  ;;  %v2702_v15 = vmax.f32 %v2638_v8, 0.0  ;;  %v5275_v0 = vmax.f32 %v4956_v20, %v5008_v22  ;;  %v5278_v20 = vmax.f32 %v4965_v2, %v5020_v41 }
 0x1cd   :  { %v2700_v44 = vmax.f32 %v2636_v62, 0.0  ;;  %v2637_v53 = vadd.f32 %v5076_v35, %v2566_v46  ;;  %v3525_v18 = vpop.f32.mrb[120].mxu0  ;;  %v3657_v11 = vpop.f32.mrb[120].mxu1  ;;  %v5277_v46 = vmax.f32 %v4961_v29, %v5016_v52  ;;  %v5280_v2 = vmax.f32 %v4970_v21, %v5028_v12 }
 0x1ce   :  { %v2471_v4 = vmax.f32 %v3517_v25, %v3525_v18  ;;  %v2507_v3 = vmax.f32 %v3649_v1, %v3657_v11  ;;  %v1838_v32 = vpop.f32.mrb[121].mxu0  ;;  %v2366_v17 = vpop.f32.mrb[121].mxu1  ;;  %v2703_v51 = vmax.f32 %v2639_v10, 0.0  ;;  %v2859_v37 = vsel %vm2708_vm3, %v2702_v15, 0.0 }
 0x1cf   :  { %v2701_v40 = vmax.f32 %v2637_v53, 0.0  ;;  %v2469_v57 = vmax.f32 %v1806_v55, %v1838_v32  ;;  %v2505_v50 = vmax.f32 %v2334_v36, %v2366_v17  ;;  %v3526_v39 = vpop.f32.mrb[122].mxu0  ;;  %v3658_v19 = vpop.f32.mrb[122].mxu1  ;;  %v2856_v49 = vsel %vm2708_vm3, %v2700_v44, 0.0 }
 0x1d0   :  { %v2535_v61 = vmax.f32 %v5274_v28, %v2471_v4  ;;  %v2571_v8 = vmax.f32 %v5275_v0, %v2507_v3  ;;  %v2472_v25 = vmax.f32 %v3518_v7, %v3526_v39  ;;  %v1841_v1 = vpop.f32.mrb[123].mxu0  ;;  %v2369_v62 = vpop.f32.mrb[123].mxu1  ;;  %v5276_v55 = vmax.f32 %v4959_v59, %v5012_v38 }
 0x1d1   :  { %v2857_v33 = vsel %vm2708_vm3, %v2701_v40, 0.0  ;;  %v2569_v10 = vmax.f32 %v5277_v46, %v2505_v50  ;;  %v2508_v44 = vmax.f32 %v3650_v60, %v3658_v19  ;;  %v5279_v59 = vmax.f32 %v4967_v27, %v5024_v30 }
 0x1d2   :  { %v2533_v36 = vmax.f32 %v5276_v55, %v2469_v57  ;;  %v2858_v14 = vadd.f32 %v2857_v33, %v2856_v49  ;;  %v2536_v22 = vmax.f32 %v5278_v20, %v2472_v25  ;;  %v2470_v18 = vmax.f32 %v1809_v6, %v1841_v1 }
 0x1d3   :  { %v2640_v53 = vadd.f32 %v5076_v35, %v2569_v10  ;;  %v2572_v38 = vmax.f32 %v5279_v59, %v2508_v44  ;;  %v2606_v29 = vadd.f32 %v5076_v35, %v2535_v61  ;;  %v2861_v52 = vsel %vm2708_vm3, %v2703_v51, 0.0 }
 0x1d4   :  { %v2604_v7 = vadd.f32 %v5076_v35, %v2533_v36  ;;  %v2860_v11 = vadd.f32 %v2859_v37, %v2858_v14  ;;  %v2642_v19 = vadd.f32 %v5076_v35, %v2571_v8  ;;  %v2534_v41 = vmax.f32 %v5280_v2, %v2470_v18  ;;  %v5287_v2 = vld [vmem:[#allocation8_spill] sm:$0xff] }
 0x1d5   :  { %v2704_v60 = vmax.f32 %v2640_v53, 0.0  ;;  %v3529_v15 = vpop.f32.mrb[124].mxu0  ;;  %v2607_v3 = vadd.f32 %v5076_v35, %v2536_v22  ;;  %v2670_v40 = vmax.f32 %v2606_v29, 0.0  ;;  %v2506_v57 = vmax.f32 %v5057_v58, %v2369_v62 }
 0x1d6   :  { %v2862_v4 = vadd.f32 %v2861_v52, %v2860_v11  ;;  %v1854_v32 = vpop.f32.mrb[125].mxu0  ;;  %v2668_v27 = vmax.f32 %v2604_v7, 0.0  ;;  %v2605_v6 = vadd.f32 %v5076_v35, %v2534_v41  ;;  %v2475_v50 = vmax.f32 %v5059_v45, %v3529_v15 }
 0x1d7   :  { %v2863_v30 = vsel %vm2708_vm3, %v2704_v60, 0.0  ;;  %v3530_v17 = vpop.f32.mrb[126].mxu0  ;;  %v2706_v21 = vmax.f32 %v2642_v19, 0.0  ;;  %v2473_v49 = vmax.f32 %v5061_v48, %v1854_v32  ;;  %v2671_v61 = vmax.f32 %v2607_v3, 0.0  ;;  %v5286_v60 = vld [vmem:[#allocation4_spill] sm:$0xff]  ;;  %v5289_v3 = vld [vmem:[#allocation5_spill] sm:$0xff] }
 0x1d8   :  { %v2864_v51 = vadd.f32 %v2863_v30, %v2862_v4  ;;  %v1857_v39 = vpop.f32.mrb[127].mxu0  ;;  %v2669_v12 = vmax.f32 %v2605_v6, 0.0  ;;  %v2476_v28 = vmax.f32 %v5063_v24, %v3530_v17  ;;  %v5281_v0 = vmax.f32 %v4972_v23, %v5032_v56  ;;  %v5292_v30 = vld [vmem:[#allocation2_spill] sm:$0xff] }
 0x1d9   :  { %v5282_v25 = vmax.f32 %v4981_v34, %v5038_v63  ;;  %v2474_v58 = vmax.f32 %v5068_v13, %v1857_v39  ;;  %v2772_v45 = vsel %vm2708_vm3, %v2668_v27, 0.0  ;;  %v5283_v48 = vmax.f32 %v4985_v54, %v5042_v31 }
 0x1da   :  { %v2570_v8 = vmax.f32 %v5281_v0, %v2506_v57  ;;  %v2773_v62 = vsel %vm2708_vm3, %v2669_v12, 0.0  ;;  %v5284_v24 = vmax.f32 %v4992_v42, %v5046_v26  ;;  %v2643_v23 = vadd.f32 %v5076_v35, %v2572_v38  ;;  %v5293_v57 = vld [vmem:[#allocation3_spill] sm:$0xff]  ;;  %v5294_v12 = vld [vmem:[#allocation6_spill] sm:$0xff] }
 0x1db   :  { %v2539_v1 = vmax.f32 %v5282_v25, %v2475_v50  ;;  %v2537_v33 = vmax.f32 %v5283_v48, %v2473_v49  ;;  %v2774_v56 = vadd.f32 %v2773_v62, %v2772_v45  ;;  %v5285_v13 = vmax.f32 %v4998_v47, %v5050_v16  ;;  %v5295_v49 = vld [vmem:[#allocation10_spill] sm:$0xff] }
 0x1dc   :  { %v2540_v55 = vmax.f32 %v5284_v24, %v2476_v28  ;;  %v2641_v34 = vadd.f32 %v5076_v35, %v2570_v8  ;;  %v2775_v36 = vsel %vm2708_vm3, %v2670_v40, 0.0  ;;  %v2867_v46 = vsel %vm2708_vm3, %v2706_v21, 0.0 }
 0x1dd   :  { %v2538_v63 = vmax.f32 %v5285_v13, %v2474_v58  ;;  %v2610_v54 = vadd.f32 %v5076_v35, %v2539_v1  ;;  %v2608_v31 = vadd.f32 %v5076_v35, %v2537_v33  ;;  %v3533_v10 = vpop.f32.mrb[128].mxu0  ;;  %v2777_v42 = vsel %vm2708_vm3, %v2671_v61, 0.0  ;;  %v5297_v1 = vld [vmem:[#allocation7_spill] sm:$0xff] }
 0x1de   :  { %v2776_v26 = vadd.f32 %v2775_v36, %v2774_v56  ;;  %v2705_v44 = vmax.f32 %v2641_v34, 0.0  ;;  %v1870_v14 = vpop.f32.mrb[129].mxu0  ;;  %v2611_v47 = vadd.f32 %v5076_v35, %v2540_v55  ;;  %v2415_v16 = vmax.f32 %v3533_v10, %v4351_v5  ;;  %v5298_v58 = vld [vmem:[#allocation11_spill] sm:$0xff]  ;;  %v5300_v34 = vld [vmem:[#allocation13_spill] sm:$0xff] }
 0x1df   :  { %v2609_v37 = vadd.f32 %v5076_v35, %v2538_v63  ;;  %v2672_v20 = vmax.f32 %v2608_v31, 0.0  ;;  %v2413_v22 = vmax.f32 %v1870_v14, %v4361_v9  ;;  %v3534_v7 = vpop.f32.mrb[130].mxu0  ;;  %v2707_v53 = vmax.f32 %v2643_v23, 0.0  ;;  %v5290_v9 = vld [vmem:[#allocation9_spill] sm:$0xff]  ;;  %v5302_v14 = vld [vmem:[#allocation12_spill] sm:$0xff] }
 0x1e0   :  { %v2865_v59 = vsel %vm2708_vm3, %v2705_v44, 0.0  ;;  %v2778_v38 = vadd.f32 %v2777_v42, %v2776_v26  ;;  %v1873_v11 = vpop.f32.mrb[131].mxu0  ;;  %v2674_v52 = vmax.f32 %v2610_v54, 0.0  ;;  %v5288_v41 = vmax.f32 %v5286_v60, %v5287_v2  ;;  %v5301_v54 = vld [vmem:[#allocation15_spill] sm:$0xff] }
 0x1e1   :  { %v2673_v18 = vmax.f32 %v2609_v37, 0.0  ;;  %v2866_v29 = vadd.f32 %v2865_v59, %v2864_v51  ;;  %v2779_v19 = vsel %vm2708_vm3, %v2672_v20, 0.0  ;;  %v5291_v32 = vmax.f32 %v5289_v3, %v5290_v9 }
 0x1e2   :  { %v2543_v15 = vmax.f32 %v2415_v16, %v5288_v41  ;;  %v2780_v4 = vadd.f32 %v2779_v19, %v2778_v38  ;;  %v2416_v6 = vmax.f32 %v3534_v7, %v5292_v30  ;;  %v2675_v40 = vmax.f32 %v2611_v47, 0.0 }
 0x1e3   :  { %v2781_v5 = vsel %vm2708_vm3, %v2673_v18, 0.0  ;;  %v2541_v27 = vmax.f32 %v2413_v22, %v5291_v32  ;;  %v2868_v17 = vadd.f32 %v2867_v46, %v2866_v29  ;;  %v2414_v51 = vmax.f32 %v1873_v11, %v5293_v57  ;;  %v5304_v18 = vld [vmem:[#allocation16_spill] sm:$0xff] }
 0x1e4   :  { %v2869_v50 = vsel %vm2708_vm3, %v2707_v53, 0.0  ;;  %v2782_v39 = vadd.f32 %v2781_v5, %v2780_v4  ;;  %v5296_v28 = vmax.f32 %v5294_v12, %v5295_v49  ;;  %v2783_v8 = vsel %vm2708_vm3, %v2674_v52, 0.0  ;;  %v5303_v53 = vld [vmem:[#allocation14_spill] sm:$0xff]  ;;  %v5305_v12 = vld [vmem:[#allocation17_spill] sm:$0xff] }
 0x1e5   :  { %v2612_v21 = vadd.f32 %v5076_v35, %v2541_v27  ;;  %v2870_v0 = vadd.f32 %v2869_v50, %v2868_v17  ;;  %v2614_v25 = vadd.f32 %v5076_v35, %v2543_v15  ;;  %v5299_v45 = vmax.f32 %v5297_v1, %v5298_v58 }
 0x1e6   :  { %v2544_v61 = vmax.f32 %v2416_v6, %v5296_v28  ;;  %v2784_v48 = vadd.f32 %v2783_v8, %v2782_v39  ;;  %v2785_v33 = vsel %vm2708_vm3, %v2675_v40, 0.0  ;;  %v2616_v13 = vadd.f32 %v5076_v35, %v5300_v34 }
 0x1e7   :  { %v2542_v62 = vmax.f32 %v2414_v51, %v5299_v45  ;;  %v2676_v24 = vmax.f32 %v2612_v21, 0.0  ;;  %v2678_v63 = vmax.f32 %v2614_v25, 0.0  ;;  %v2617_v31 = vadd.f32 %v5076_v35, %v5301_v54 }
 0x1e8   :  { %v2615_v55 = vadd.f32 %v5076_v35, %v2544_v61  ;;  %v2786_v56 = vadd.f32 %v2785_v33, %v2784_v48  ;;  %v2618_v20 = vadd.f32 %v5076_v35, %v5302_v14  ;;  %v2680_v47 = vmax.f32 %v2616_v13, 0.0 }
 0x1e9   :  { %v2613_v23 = vadd.f32 %v5076_v35, %v2542_v62  ;;  %v2793_v10 = vsel %vm2708_vm3, %v2676_v24, 0.0  ;;  %v2796_v16 = vsel %vm2708_vm3, %v2678_v63, 0.0  ;;  %v2619_v59 = vadd.f32 %v5076_v35, %v5303_v53 }
 0x1ea   :  { %v2787_v46 = vrot.slane %v2786_v56, 4  ;;  %v2679_v42 = vmax.f32 %v2615_v55, 0.0  ;;  %v2681_v38 = vmax.f32 %v2617_v31, 0.0  ;;  %v2829_v11 = vrot.slane %v5304_v18, 4 }
 0x1eb   :  { %v2677_v36 = vmax.f32 %v2613_v23, 0.0  ;;  %v2850_v52 = vrot.slane %v4978_v43, 4  ;;  %v2682_v2 = vmax.f32 %v2618_v20, 0.0  ;;  %v2800_v41 = vsel %vm2708_vm3, %v2680_v47, 0.0 }
 0x1ec   :  { %v2788_v44 = vadd.f32 %v2787_v46, %v2786_v56  ;;  %v2798_v29 = vsel %vm2708_vm3, %v2679_v42, 0.0  ;;  %v2871_v15 = vrot.slane %v2870_v0, 4  ;;  %v2683_v3 = vmax.f32 %v2619_v59, 0.0  ;;  %v3258_v42 = vld [vmem:[%s5209_s4] ss:$0 sm:$0xff] }
 0x1ed   :  { %v2794_v26 = vsel %vm2708_vm3, %v2677_v36, 0.0  ;;  %v2802_v9 = vsel %vm2708_vm3, %v2681_v38, 0.0  ;;  %v2830_v35 = vadd.f32 %v2829_v11, %v5304_v18  ;;  %v2851_v32 = vadd.f32 %v2850_v52, %v4978_v43 }
 0x1ee   :  { %v2795_v37 = vadd.f32 %v2794_v26, %v2793_v10  ;;  %v2789_v22 = vrot.slane %v2788_v44, 2  ;;  %v2804_v6 = vsel %vm2708_vm3, %v2682_v2, 0.0  ;;  %v2872_v17 = vadd.f32 %v2871_v15, %v2870_v0 }
 0x1ef   :  { %v2806_v51 = vsel %vm2708_vm3, %v2683_v3, 0.0  ;;  %v2831_v50 = vrot.slane %v2830_v35, 2  ;;  %v2852_v39 = vrot.slane %v2851_v32, 2 }
 0x1f0   :  { %v2797_v7 = vadd.f32 %v2796_v16, %v2795_v37  ;;  %v2790_v19 = vadd.f32 %v2789_v22, %v2788_v44  ;;  %v2873_v28 = vrot.slane %v2872_v17, 2 }
 0x1f1   :  { %v2832_v8 = vadd.f32 %v2831_v50, %v2830_v35  ;;  %v2853_v25 = vadd.f32 %v2852_v39, %v2851_v32 }
 0x1f2   :  { %v2799_v60 = vadd.f32 %v2798_v29, %v2797_v7  ;;  %v2791_v4 = vrot.slane %v2790_v19, 1  ;;  %v2874_v1 = vadd.f32 %v2873_v28, %v2872_v17 }
 0x1f3   :  { %v2833_v45 = vrot.slane %v2832_v8, 1  ;;  %v2854_v0 = vrot.slane %v2853_v25, 1 }
 0x1f4   :  { %v2801_v5 = vadd.f32 %v2800_v41, %v2799_v60  ;;  %v2792_v27 = vadd.f32 %v2791_v4, %v2790_v19  ;;  %v2875_v48 = vrot.slane %v2874_v1, 1 }
 0x1f5   :  { %v2834_v24 = vadd.f32 %v2833_v45, %v2832_v8  ;;  %v2855_v23 = vadd.f32 %v2854_v0, %v2853_v25 }
 0x1f6   :  { %v2803_v30 = vadd.f32 %v2802_v9, %v2801_v5  ;;  %v2880_v40 = vmul.f32 0.015625, %v2792_v27  ;;  %v2876_v56 = vadd.f32 %v2875_v48, %v2874_v1 }
 0x1f7   :  { %v2882_v13 = vmul.f32 0.015625, %v2834_v24  ;;  %v2883_v63 = vmul.f32 0.015625, %v2855_v23 }
 0x1f8   :  { %v2805_v57 = vadd.f32 %v2804_v6, %v2803_v30  ;;  %v2913_v49 = vsel %vm2912_vm7, %v2880_v40, %v5305_v12  ;;  %v2884_v46 = vmul.f32 0.015625, %v2876_v56 }
 0x1fa   :  { %v2807_v21 = vadd.f32 %v2806_v51, %v2805_v57 }
 0x1fc   :  { %v2808_v61 = vrot.slane %v2807_v21, 4 }
 0x1fe   :  { %v2809_v43 = vadd.f32 %v2808_v61, %v2807_v21 }
 0x200   :  { %v2810_v58 = vrot.slane %v2809_v43, 2 }
 0x202   :  { %v2811_v62 = vadd.f32 %v2810_v58, %v2809_v43 }
 0x204   :  { %v2812_v33 = vrot.slane %v2811_v62, 1 }
 0x206   :  { %v2813_v55 = vadd.f32 %v2812_v33, %v2811_v62 }
 0x208   :  { %v2881_v34 = vmul.f32 0.015625, %v2813_v55 }
 0x20a   :  { %v2915_v36 = vsel %vm2914_vm8, %v2881_v34, %v2913_v49 }
 0x20b   :  { %v2917_v54 = vsel %vm2916_vm9, %v2882_v13, %v2915_v36 }
 0x20c   :  { %v2919_v31 = vsel %vm2918_vm10, %v2883_v63, %v2917_v54 }
 0x20d   :  { %v2921_v10 = vsel %vm2920_vm11, %v2884_v46, %v2919_v31 }
 0x20e   :  { %3676 = vmatmul.mubr.msk.f32.vlgmr.msra.gmra.mrb[124].mxu1 %vm2708_vm3, %v2921_v10 }
 0x2e1   :  { %v2990_v26 = vpop.f32.mrb[124].mxu1 }
 0x2e2   :  { %v2991_v44 = vadd.f32 %v3258_v42, %v2990_v26  ;;  %v3677_v37 = vpop.f32.mrb[125].mxu1 }
 0x2e4   :  { %2994 = vst [vmem:[%s5210_s5] sm:$0xff] %v2991_v44 }

</bundles_post_ra>
